<compile_context>
chip_gen: v7x
topology: tpu7x:2x2x1
jax: 0.10.0
libtpu: 0.0.40
codegen_flags: <defaults>
</compile_context>

<pallas_src>
import numpy as np
import jax
import jax.numpy as jnp
from jax import lax
from jax.experimental import pallas as pl
from jax.experimental.pallas import tpu as pltpu

H = 16
W = 16
CIN = 1
COUT = 32
KH = KW = 3
EPS = 1e-5
HP, WP = H // 2, W // 2
NPIX = H * W                       # 256 flat conv pixels (lane axis)
NPOOL = HP * WP                    # 64 flat pooled pixels
HALO = (KH // 2) * W + (KW // 2)   # 17 = max |lane shift| of a 3x3 tap

_TAPS = tuple((dy - 1, dx - 1) for dy in range(KH) for dx in range(KW))


def me_kernel(x_ref, w_ref, b_ref, m_ref, sel_ref, o_ref):
    """One batched block: conv3x3 + folded-BN + ReLU + 2x2 maxpool, NCHW out.

    x_ref  : (B, 1, NPIX)      f32  flat images, lane p = h*W + w
    w_ref  : (9, COUT, 1)      f32  BN-scale-folded conv taps
    b_ref  : (COUT, 1)         f32  folded BN bias
    m_ref  : (9, 1, NPIX)      f32  0/1 validity mask per tap (pad=1 halo)
    sel_ref: (NPIX, 4*NPOOL)   f32  0/1 pool-corner selection matrix
    o_ref  : (B, COUT, NPOOL)  f32  NCHW output, pooled pixels flat on lanes
    """
    B = x_ref.shape[0]
    x = x_ref[...]                                           # (B, 1, NPIX)

    # zero halo on the lane axis so every 3x3 tap is a static lane slice
    zpad = jnp.zeros((B, 1, HALO), jnp.float32)
    xp = jnp.concatenate([zpad, x, zpad], axis=2)            # (B, 1, NPIX+2*HALO)

    acc = None
    for t, (oy, ox) in enumerate(_TAPS):
        s = oy * W + ox                                      # lane shift of tap t
        shifted = xp[:, :, HALO + s: HALO + s + NPIX]        # (B, 1, NPIX)
        tap = shifted * m_ref[t][None, :, :]                 # zero out-of-image taps
        contrib = tap * w_ref[t][None, :, :]                 # (B, COUT, NPIX)
        acc = contrib if acc is None else acc + contrib

    y = acc + b_ref[...][None, :, :]                         # folded BN bias
    y = jnp.maximum(y, 0.0)                                  # ReLU

    # 2x2 / stride-2 max pool: gather the 4 window corners with one MXU matmul
    # against a constant 0/1 selector, then 3 element-wise maxima.
    y2 = y.reshape(B * COUT, NPIX)
    r = jnp.dot(y2, sel_ref[...], preferred_element_type=jnp.float32)
    pooled = jnp.maximum(
        jnp.maximum(r[:, 0 * NPOOL:1 * NPOOL], r[:, 1 * NPOOL:2 * NPOOL]),
        jnp.maximum(r[:, 2 * NPOOL:3 * NPOOL], r[:, 3 * NPOOL:4 * NPOOL]))
    o_ref[...] = pooled.reshape(B, COUT, NPOOL)


def _pool_selector():
    """(NPIX, 4*NPOOL) 0/1 matrix: column q*NPOOL+j picks corner q of window j."""
    sel = np.zeros((NPIX, 4 * NPOOL), np.float32)
    for hp in range(HP):
        for wp in range(WP):
            j = hp * WP + wp
            for a in range(2):
                for b in range(2):
                    q = a * 2 + b
                    sel[(2 * hp + a) * W + (2 * wp + b), q * NPOOL + j] = 1.0
    return jnp.asarray(sel)


def _tap_masks():
    """(9, 1, NPIX) 0/1 masks: valid source pixel for each 3x3 tap (pad=1)."""
    m = np.zeros((KH * KW, 1, NPIX), np.float32)
    for t, (oy, ox) in enumerate(_TAPS):
        for h in range(H):
            for w in range(W):
                if 0 <= h + oy < H and 0 <= w + ox < W:
                    m[t, 0, h * W + w] = 1.0
    return jnp.asarray(m)


def me_forward(x_nchw, w_hwio, gamma, beta, running_mean, running_var,
               *, block_b=16):
    """x_nchw: (N, 1, 16, 16) f32 -> (N, 32, 8, 8) f32 (conv+BN+ReLU+maxpool)."""
    N, cin, hh, ww = x_nchw.shape
    assert (cin, hh, ww) == (CIN, H, W)

    # ---- one-off parameter preprocessing (tiny; BN folded into conv) ----
    scale = gamma / jnp.sqrt(running_var + EPS)                    # (COUT,)
    bias = beta - running_mean * scale                             # (COUT,)
    # TODO(synk): if md.ConvBlock's Conv2d has a bias b_c, fold it: bias += b_c * scale
    w_folded = (w_hwio.reshape(KH * KW * CIN, COUT) * scale[None, :])[:, :, None]
    bias_col = bias[:, None]                                       # (COUT, 1)
    tap_mask = _tap_masks()                                        # (9, 1, NPIX)
    pool_sel = _pool_selector()                                    # (NPIX, 4*NPOOL)

    # ---- batch blocking ----
    B = min(block_b, N)
    n_blocks = pl.cdiv(N, B)
    n_pad = n_blocks * B
    xflat = x_nchw.reshape(N, 1, NPIX)               # contiguous -> bitcast
    if n_pad != N:
        xflat = jnp.pad(xflat, ((0, n_pad - N), (0, 0), (0, 0)))

    out = pl.pallas_call(
        me_kernel,
        out_shape=jax.ShapeDtypeStruct((n_pad, COUT, NPOOL), jnp.float32),
        grid_spec=pltpu.PrefetchScalarGridSpec(
            num_scalar_prefetch=0,
            grid=(n_blocks,),
            in_specs=[
                pl.BlockSpec((B, 1, NPIX), lambda n: (n, 0, 0)),
                pl.BlockSpec((KH * KW, COUT, 1), lambda n: (0, 0, 0)),
                pl.BlockSpec((COUT, 1), lambda n: (0, 0)),
                pl.BlockSpec((KH * KW, 1, NPIX), lambda n: (0, 0, 0)),
                pl.BlockSpec((NPIX, 4 * NPOOL), lambda n: (0, 0)),
            ],
            out_specs=pl.BlockSpec((B, COUT, NPOOL), lambda n: (n, 0, 0)),
        ),
        compiler_params=pltpu.CompilerParams(
            dimension_semantics=("parallel",)),
    )(xflat, w_folded, bias_col, tap_mask, pool_sel)

    out = out[:N]                                    # drop batch padding (if any)
    return out.reshape(N, COUT, HP, WP)              # contiguous -> NCHW bitcast


def me_reference(x_nchw, w_hwio, gamma, beta, running_mean, running_var):
    """Pure-JAX reference (conv + BN + ReLU + maxpool) for sanity checking."""
    w_oihw = jnp.transpose(w_hwio, (3, 2, 0, 1))               # (COUT, CIN, 3, 3)
    y = lax.conv_general_dilated(
        x_nchw, w_oihw, window_strides=(1, 1), padding=((1, 1), (1, 1)),
        dimension_numbers=("NCHW", "OIHW", "NCHW"),
        precision=lax.Precision.HIGHEST)
    scale = gamma / jnp.sqrt(running_var + EPS)
    bias = beta - running_mean * scale
    y = y * scale[None, :, None, None] + bias[None, :, None, None]
    y = jnp.maximum(y, 0.0)
    y = lax.reduce_window(y, -jnp.inf, lax.max,
                          window_dimensions=(1, 1, 2, 2),
                          window_strides=(1, 1, 2, 2),
                          padding="VALID")
    return y


if __name__ == "__main__":
    key = jax.random.PRNGKey(0)
    kx, kw, kg, kb, km, kv = jax.random.split(key, 6)

    N = 2
    x = jax.random.normal(kx, (N, CIN, H, W), dtype=jnp.float32)

    # deterministic synthetic parameters (no checkpoint load)
    w_hwio = 0.1 * jax.random.normal(kw, (KH, KW, CIN, COUT), dtype=jnp.float32)
    gamma = 1.0 + 0.05 * jax.random.normal(kg, (COUT,), dtype=jnp.float32)
    beta = 0.05 * jax.random.normal(kb, (COUT,), dtype=jnp.float32)
    running_mean = 0.1 * jax.random.normal(km, (COUT,), dtype=jnp.float32)
    running_var = 1.0 + 0.1 * jax.random.uniform(kv, (COUT,), dtype=jnp.float32)

    out = me_forward(x, w_hwio, gamma, beta, running_mean, running_var)
    out = jax.block_until_ready(out)

    ref = me_reference(x, w_hwio, gamma, beta, running_mean, running_var)
    assert out.shape == (N, COUT, HP, WP), out.shape
    max_err = float(jnp.max(jnp.abs(out - ref)))
    assert jnp.allclose(out, ref, atol=1e-4, rtol=1e-4), max_err

    print("KERNEL_OK")
</pallas_src>

<mosaic_0001>
module attributes {stable_mosaic.version = 11 : i64} {
  func.func @me_kernel(%arg0: i32, %arg1: memref<2x1x256xf32, #tpu.memory_space<vmem>>, %arg2: memref<9x32x1xf32, #tpu.memory_space<vmem>>, %arg3: memref<32x1xf32, #tpu.memory_space<vmem>>, %arg4: memref<9x1x256xf32, #tpu.memory_space<vmem>>, %arg5: memref<256x256xf32, #tpu.memory_space<vmem>>, %arg6: memref<2x32x64xf32, #tpu.memory_space<vmem>>) attributes {dimension_semantics = [#tpu.dimension_semantics<parallel>], iteration_bounds = array<i64: 1>, scalar_prefetch = 0 : i64, scratch_operands = 0 : i64, tpu.core_type = #tpu.core_type<tc>, window_params = [{transform_indices = @transform_0, window_bounds = array<i64: 2, 1, 256>}, {pipeline_mode = #tpu.pipeline_mode<synchronous>, transform_indices = @transform_1, window_bounds = array<i64: 9, 32, 1>}, {pipeline_mode = #tpu.pipeline_mode<synchronous>, transform_indices = @transform_2, window_bounds = array<i64: 32, 1>}, {pipeline_mode = #tpu.pipeline_mode<synchronous>, transform_indices = @transform_3, window_bounds = array<i64: 9, 1, 256>}, {pipeline_mode = #tpu.pipeline_mode<synchronous>, transform_indices = @transform_4, window_bounds = array<i64: 256, 256>}, {transform_indices = @transform_5, window_bounds = array<i64: 2, 32, 64>}]} {
    %c0 = arith.constant 0 : index
    %c0_0 = arith.constant 0 : index
    %c0_1 = arith.constant 0 : index
    %0 = vector.load %arg1[%c0, %c0_0, %c0_1] : memref<2x1x256xf32, #tpu.memory_space<vmem>>, vector<2x1x256xf32>
    %cst = arith.constant 0.000000e+00 : f32
    %1 = vector.broadcast %cst : f32 to vector<2x1x17xf32>
    %2 = tpu.concatenate %1, %0, %1 in 2 : vector<2x1x17xf32>, vector<2x1x256xf32>, vector<2x1x17xf32> -> vector<2x1x290xf32>
    %3 = vector.extract_strided_slice %2 {offsets = [0, 0, 0], sizes = [2, 1, 256], strides = [1, 1, 1]} : vector<2x1x290xf32> to vector<2x1x256xf32>
    %c0_2 = arith.constant 0 : index
    %c0_3 = arith.constant 0 : index
    %c0_4 = arith.constant 0 : index
    %4 = vector.load %arg4[%c0_2, %c0_3, %c0_4] : memref<9x1x256xf32, #tpu.memory_space<vmem>>, vector<1x1x256xf32>
    %5 = vector.shape_cast %4 : vector<1x1x256xf32> to vector<1x256xf32>
    %6 = vector.shape_cast %5 : vector<1x256xf32> to vector<1x1x256xf32>
    %7 = vector.broadcast %6 : vector<1x1x256xf32> to vector<2x1x256xf32>
    %8 = arith.mulf %3, %7 : vector<2x1x256xf32>
    %c0_5 = arith.constant 0 : index
    %c0_6 = arith.constant 0 : index
    %c0_7 = arith.constant 0 : index
    %9 = vector.load %arg2[%c0_5, %c0_6, %c0_7] : memref<9x32x1xf32, #tpu.memory_space<vmem>>, vector<1x32x1xf32>
    %10 = vector.shape_cast %9 : vector<1x32x1xf32> to vector<32x1xf32>
    %11 = vector.shape_cast %10 : vector<32x1xf32> to vector<1x32x1xf32>
    %12 = vector.broadcast %8 : vector<2x1x256xf32> to vector<2x32x256xf32>
    %13 = vector.broadcast %11 : vector<1x32x1xf32> to vector<2x32x256xf32>
    %14 = arith.mulf %12, %13 : vector<2x32x256xf32>
    %15 = vector.extract_strided_slice %2 {offsets = [0, 0, 1], sizes = [2, 1, 256], strides = [1, 1, 1]} : vector<2x1x290xf32> to vector<2x1x256xf32>
    %c1 = arith.constant 1 : index
    %c0_8 = arith.constant 0 : index
    %c0_9 = arith.constant 0 : index
    %16 = vector.load %arg4[%c1, %c0_8, %c0_9] : memref<9x1x256xf32, #tpu.memory_space<vmem>>, vector<1x1x256xf32>
    %17 = vector.shape_cast %16 : vector<1x1x256xf32> to vector<1x256xf32>
    %18 = vector.shape_cast %17 : vector<1x256xf32> to vector<1x1x256xf32>
    %19 = vector.broadcast %18 : vector<1x1x256xf32> to vector<2x1x256xf32>
    %20 = arith.mulf %15, %19 : vector<2x1x256xf32>
    %c1_10 = arith.constant 1 : index
    %c0_11 = arith.constant 0 : index
    %c0_12 = arith.constant 0 : index
    %21 = vector.load %arg2[%c1_10, %c0_11, %c0_12] : memref<9x32x1xf32, #tpu.memory_space<vmem>>, vector<1x32x1xf32>
    %22 = vector.shape_cast %21 : vector<1x32x1xf32> to vector<32x1xf32>
    %23 = vector.shape_cast %22 : vector<32x1xf32> to vector<1x32x1xf32>
    %24 = vector.broadcast %20 : vector<2x1x256xf32> to vector<2x32x256xf32>
    %25 = vector.broadcast %23 : vector<1x32x1xf32> to vector<2x32x256xf32>
    %26 = arith.mulf %24, %25 : vector<2x32x256xf32>
    %27 = arith.addf %14, %26 : vector<2x32x256xf32>
    %28 = vector.extract_strided_slice %2 {offsets = [0, 0, 2], sizes = [2, 1, 256], strides = [1, 1, 1]} : vector<2x1x290xf32> to vector<2x1x256xf32>
    %c2 = arith.constant 2 : index
    %c0_13 = arith.constant 0 : index
    %c0_14 = arith.constant 0 : index
    %29 = vector.load %arg4[%c2, %c0_13, %c0_14] : memref<9x1x256xf32, #tpu.memory_space<vmem>>, vector<1x1x256xf32>
    %30 = vector.shape_cast %29 : vector<1x1x256xf32> to vector<1x256xf32>
    %31 = vector.shape_cast %30 : vector<1x256xf32> to vector<1x1x256xf32>
    %32 = vector.broadcast %31 : vector<1x1x256xf32> to vector<2x1x256xf32>
    %33 = arith.mulf %28, %32 : vector<2x1x256xf32>
    %c2_15 = arith.constant 2 : index
    %c0_16 = arith.constant 0 : index
    %c0_17 = arith.constant 0 : index
    %34 = vector.load %arg2[%c2_15, %c0_16, %c0_17] : memref<9x32x1xf32, #tpu.memory_space<vmem>>, vector<1x32x1xf32>
    %35 = vector.shape_cast %34 : vector<1x32x1xf32> to vector<32x1xf32>
    %36 = vector.shape_cast %35 : vector<32x1xf32> to vector<1x32x1xf32>
    %37 = vector.broadcast %33 : vector<2x1x256xf32> to vector<2x32x256xf32>
    %38 = vector.broadcast %36 : vector<1x32x1xf32> to vector<2x32x256xf32>
    %39 = arith.mulf %37, %38 : vector<2x32x256xf32>
    %40 = arith.addf %27, %39 : vector<2x32x256xf32>
    %41 = vector.extract_strided_slice %2 {offsets = [0, 0, 16], sizes = [2, 1, 256], strides = [1, 1, 1]} : vector<2x1x290xf32> to vector<2x1x256xf32>
    %c3 = arith.constant 3 : index
    %c0_18 = arith.constant 0 : index
    %c0_19 = arith.constant 0 : index
    %42 = vector.load %arg4[%c3, %c0_18, %c0_19] : memref<9x1x256xf32, #tpu.memory_space<vmem>>, vector<1x1x256xf32>
    %43 = vector.shape_cast %42 : vector<1x1x256xf32> to vector<1x256xf32>
    %44 = vector.shape_cast %43 : vector<1x256xf32> to vector<1x1x256xf32>
    %45 = vector.broadcast %44 : vector<1x1x256xf32> to vector<2x1x256xf32>
    %46 = arith.mulf %41, %45 : vector<2x1x256xf32>
    %c3_20 = arith.constant 3 : index
    %c0_21 = arith.constant 0 : index
    %c0_22 = arith.constant 0 : index
    %47 = vector.load %arg2[%c3_20, %c0_21, %c0_22] : memref<9x32x1xf32, #tpu.memory_space<vmem>>, vector<1x32x1xf32>
    %48 = vector.shape_cast %47 : vector<1x32x1xf32> to vector<32x1xf32>
    %49 = vector.shape_cast %48 : vector<32x1xf32> to vector<1x32x1xf32>
    %50 = vector.broadcast %46 : vector<2x1x256xf32> to vector<2x32x256xf32>
    %51 = vector.broadcast %49 : vector<1x32x1xf32> to vector<2x32x256xf32>
    %52 = arith.mulf %50, %51 : vector<2x32x256xf32>
    %53 = arith.addf %40, %52 : vector<2x32x256xf32>
    %54 = vector.extract_strided_slice %2 {offsets = [0, 0, 17], sizes = [2, 1, 256], strides = [1, 1, 1]} : vector<2x1x290xf32> to vector<2x1x256xf32>
    %c4 = arith.constant 4 : index
    %c0_23 = arith.constant 0 : index
    %c0_24 = arith.constant 0 : index
    %55 = vector.load %arg4[%c4, %c0_23, %c0_24] : memref<9x1x256xf32, #tpu.memory_space<vmem>>, vector<1x1x256xf32>
    %56 = vector.shape_cast %55 : vector<1x1x256xf32> to vector<1x256xf32>
    %57 = vector.shape_cast %56 : vector<1x256xf32> to vector<1x1x256xf32>
    %58 = vector.broadcast %57 : vector<1x1x256xf32> to vector<2x1x256xf32>
    %59 = arith.mulf %54, %58 : vector<2x1x256xf32>
    %c4_25 = arith.constant 4 : index
    %c0_26 = arith.constant 0 : index
    %c0_27 = arith.constant 0 : index
    %60 = vector.load %arg2[%c4_25, %c0_26, %c0_27] : memref<9x32x1xf32, #tpu.memory_space<vmem>>, vector<1x32x1xf32>
    %61 = vector.shape_cast %60 : vector<1x32x1xf32> to vector<32x1xf32>
    %62 = vector.shape_cast %61 : vector<32x1xf32> to vector<1x32x1xf32>
    %63 = vector.broadcast %59 : vector<2x1x256xf32> to vector<2x32x256xf32>
    %64 = vector.broadcast %62 : vector<1x32x1xf32> to vector<2x32x256xf32>
    %65 = arith.mulf %63, %64 : vector<2x32x256xf32>
    %66 = arith.addf %53, %65 : vector<2x32x256xf32>
    %67 = vector.extract_strided_slice %2 {offsets = [0, 0, 18], sizes = [2, 1, 256], strides = [1, 1, 1]} : vector<2x1x290xf32> to vector<2x1x256xf32>
    %c5 = arith.constant 5 : index
    %c0_28 = arith.constant 0 : index
    %c0_29 = arith.constant 0 : index
    %68 = vector.load %arg4[%c5, %c0_28, %c0_29] : memref<9x1x256xf32, #tpu.memory_space<vmem>>, vector<1x1x256xf32>
    %69 = vector.shape_cast %68 : vector<1x1x256xf32> to vector<1x256xf32>
    %70 = vector.shape_cast %69 : vector<1x256xf32> to vector<1x1x256xf32>
    %71 = vector.broadcast %70 : vector<1x1x256xf32> to vector<2x1x256xf32>
    %72 = arith.mulf %67, %71 : vector<2x1x256xf32>
    %c5_30 = arith.constant 5 : index
    %c0_31 = arith.constant 0 : index
    %c0_32 = arith.constant 0 : index
    %73 = vector.load %arg2[%c5_30, %c0_31, %c0_32] : memref<9x32x1xf32, #tpu.memory_space<vmem>>, vector<1x32x1xf32>
    %74 = vector.shape_cast %73 : vector<1x32x1xf32> to vector<32x1xf32>
    %75 = vector.shape_cast %74 : vector<32x1xf32> to vector<1x32x1xf32>
    %76 = vector.broadcast %72 : vector<2x1x256xf32> to vector<2x32x256xf32>
    %77 = vector.broadcast %75 : vector<1x32x1xf32> to vector<2x32x256xf32>
    %78 = arith.mulf %76, %77 : vector<2x32x256xf32>
    %79 = arith.addf %66, %78 : vector<2x32x256xf32>
    %80 = vector.extract_strided_slice %2 {offsets = [0, 0, 32], sizes = [2, 1, 256], strides = [1, 1, 1]} : vector<2x1x290xf32> to vector<2x1x256xf32>
    %c6 = arith.constant 6 : index
    %c0_33 = arith.constant 0 : index
    %c0_34 = arith.constant 0 : index
    %81 = vector.load %arg4[%c6, %c0_33, %c0_34] : memref<9x1x256xf32, #tpu.memory_space<vmem>>, vector<1x1x256xf32>
    %82 = vector.shape_cast %81 : vector<1x1x256xf32> to vector<1x256xf32>
    %83 = vector.shape_cast %82 : vector<1x256xf32> to vector<1x1x256xf32>
    %84 = vector.broadcast %83 : vector<1x1x256xf32> to vector<2x1x256xf32>
    %85 = arith.mulf %80, %84 : vector<2x1x256xf32>
    %c6_35 = arith.constant 6 : index
    %c0_36 = arith.constant 0 : index
    %c0_37 = arith.constant 0 : index
    %86 = vector.load %arg2[%c6_35, %c0_36, %c0_37] : memref<9x32x1xf32, #tpu.memory_space<vmem>>, vector<1x32x1xf32>
    %87 = vector.shape_cast %86 : vector<1x32x1xf32> to vector<32x1xf32>
    %88 = vector.shape_cast %87 : vector<32x1xf32> to vector<1x32x1xf32>
    %89 = vector.broadcast %85 : vector<2x1x256xf32> to vector<2x32x256xf32>
    %90 = vector.broadcast %88 : vector<1x32x1xf32> to vector<2x32x256xf32>
    %91 = arith.mulf %89, %90 : vector<2x32x256xf32>
    %92 = arith.addf %79, %91 : vector<2x32x256xf32>
    %93 = vector.extract_strided_slice %2 {offsets = [0, 0, 33], sizes = [2, 1, 256], strides = [1, 1, 1]} : vector<2x1x290xf32> to vector<2x1x256xf32>
    %c7 = arith.constant 7 : index
    %c0_38 = arith.constant 0 : index
    %c0_39 = arith.constant 0 : index
    %94 = vector.load %arg4[%c7, %c0_38, %c0_39] : memref<9x1x256xf32, #tpu.memory_space<vmem>>, vector<1x1x256xf32>
    %95 = vector.shape_cast %94 : vector<1x1x256xf32> to vector<1x256xf32>
    %96 = vector.shape_cast %95 : vector<1x256xf32> to vector<1x1x256xf32>
    %97 = vector.broadcast %96 : vector<1x1x256xf32> to vector<2x1x256xf32>
    %98 = arith.mulf %93, %97 : vector<2x1x256xf32>
    %c7_40 = arith.constant 7 : index
    %c0_41 = arith.constant 0 : index
    %c0_42 = arith.constant 0 : index
    %99 = vector.load %arg2[%c7_40, %c0_41, %c0_42] : memref<9x32x1xf32, #tpu.memory_space<vmem>>, vector<1x32x1xf32>
    %100 = vector.shape_cast %99 : vector<1x32x1xf32> to vector<32x1xf32>
    %101 = vector.shape_cast %100 : vector<32x1xf32> to vector<1x32x1xf32>
    %102 = vector.broadcast %98 : vector<2x1x256xf32> to vector<2x32x256xf32>
    %103 = vector.broadcast %101 : vector<1x32x1xf32> to vector<2x32x256xf32>
    %104 = arith.mulf %102, %103 : vector<2x32x256xf32>
    %105 = arith.addf %92, %104 : vector<2x32x256xf32>
    %106 = vector.extract_strided_slice %2 {offsets = [0, 0, 34], sizes = [2, 1, 256], strides = [1, 1, 1]} : vector<2x1x290xf32> to vector<2x1x256xf32>
    %c8 = arith.constant 8 : index
    %c0_43 = arith.constant 0 : index
    %c0_44 = arith.constant 0 : index
    %107 = vector.load %arg4[%c8, %c0_43, %c0_44] : memref<9x1x256xf32, #tpu.memory_space<vmem>>, vector<1x1x256xf32>
    %108 = vector.shape_cast %107 : vector<1x1x256xf32> to vector<1x256xf32>
    %109 = vector.shape_cast %108 : vector<1x256xf32> to vector<1x1x256xf32>
    %110 = vector.broadcast %109 : vector<1x1x256xf32> to vector<2x1x256xf32>
    %111 = arith.mulf %106, %110 : vector<2x1x256xf32>
    %c8_45 = arith.constant 8 : index
    %c0_46 = arith.constant 0 : index
    %c0_47 = arith.constant 0 : index
    %112 = vector.load %arg2[%c8_45, %c0_46, %c0_47] : memref<9x32x1xf32, #tpu.memory_space<vmem>>, vector<1x32x1xf32>
    %113 = vector.shape_cast %112 : vector<1x32x1xf32> to vector<32x1xf32>
    %114 = vector.shape_cast %113 : vector<32x1xf32> to vector<1x32x1xf32>
    %115 = vector.broadcast %111 : vector<2x1x256xf32> to vector<2x32x256xf32>
    %116 = vector.broadcast %114 : vector<1x32x1xf32> to vector<2x32x256xf32>
    %117 = arith.mulf %115, %116 : vector<2x32x256xf32>
    %118 = arith.addf %105, %117 : vector<2x32x256xf32>
    %c0_48 = arith.constant 0 : index
    %c0_49 = arith.constant 0 : index
    %119 = vector.load %arg3[%c0_48, %c0_49] : memref<32x1xf32, #tpu.memory_space<vmem>>, vector<32x1xf32>
    %120 = vector.shape_cast %119 : vector<32x1xf32> to vector<1x32x1xf32>
    %121 = vector.broadcast %120 : vector<1x32x1xf32> to vector<2x32x256xf32>
    %122 = arith.addf %118, %121 : vector<2x32x256xf32>
    %cst_50 = arith.constant 0.000000e+00 : f32
    %123 = vector.broadcast %cst_50 : f32 to vector<2x32x256xf32>
    %124 = arith.maximumf %122, %123 : vector<2x32x256xf32>
    %125 = vector.shape_cast %124 : vector<2x32x256xf32> to vector<64x256xf32>
    %c0_51 = arith.constant 0 : index
    %c0_52 = arith.constant 0 : index
    %126 = vector.load %arg5[%c0_51, %c0_52] : memref<256x256xf32, #tpu.memory_space<vmem>>, vector<256x256xf32>
    %cst_53 = arith.constant dense<0.000000e+00> : vector<64x256xf32>
    %127 = tpu.matmul %125, %126, %cst_53 {dimension_numbers = #tpu.dot_dimension_numbers<[1], [0], [0], [1], [0, 0, 1, 1], [], []>} : vector<64x256xf32>, vector<256x256xf32>, vector<64x256xf32> -> vector<64x256xf32>
    %128 = vector.extract_strided_slice %127 {offsets = [0, 0], sizes = [64, 64], strides = [1, 1]} : vector<64x256xf32> to vector<64x64xf32>
    %129 = vector.extract_strided_slice %127 {offsets = [0, 64], sizes = [64, 64], strides = [1, 1]} : vector<64x256xf32> to vector<64x64xf32>
    %130 = arith.maximumf %128, %129 : vector<64x64xf32>
    %131 = vector.extract_strided_slice %127 {offsets = [0, 128], sizes = [64, 64], strides = [1, 1]} : vector<64x256xf32> to vector<64x64xf32>
    %132 = vector.extract_strided_slice %127 {offsets = [0, 192], sizes = [64, 64], strides = [1, 1]} : vector<64x256xf32> to vector<64x64xf32>
    %133 = arith.maximumf %131, %132 : vector<64x64xf32>
    %134 = arith.maximumf %130, %133 : vector<64x64xf32>
    %135 = vector.shape_cast %134 : vector<64x64xf32> to vector<2x32x64xf32>
    %c0_54 = arith.constant 0 : index
    %c0_55 = arith.constant 0 : index
    %c0_56 = arith.constant 0 : index
    %136 = vector.load %arg6[%c0_54, %c0_55, %c0_56] : memref<2x32x64xf32, #tpu.memory_space<vmem>>, vector<2x32x64xf32>
    tpu.vector_store %arg6[%c0_54, %c0_55, %c0_56], %135 {strides = array<i32>} : memref<2x32x64xf32, #tpu.memory_space<vmem>>, vector<2x32x64xf32>,
    return
  }
  func.func @transform_0(%arg0: i32) -> (i32, i32, i32) {
    %c0_i32 = arith.constant 0 : i32
    %c0_i32_0 = arith.constant 0 : i32
    %c0_i32_1 = arith.constant 0 : i32
    return %arg0, %c0_i32, %c0_i32_0 : i32, i32, i32
  }
  func.func @transform_1(%arg0: i32) -> (i32, i32, i32) {
    %c0_i32 = arith.constant 0 : i32
    %c0_i32_0 = arith.constant 0 : i32
    %c0_i32_1 = arith.constant 0 : i32
    %c0_i32_2 = arith.constant 0 : i32
    return %c0_i32, %c0_i32_0, %c0_i32_1 : i32, i32, i32
  }
  func.func @transform_2(%arg0: i32) -> (i32, i32) {
    %c0_i32 = arith.constant 0 : i32
    %c0_i32_0 = arith.constant 0 : i32
    %c0_i32_1 = arith.constant 0 : i32
    return %c0_i32, %c0_i32_0 : i32, i32
  }
  func.func @transform_3(%arg0: i32) -> (i32, i32, i32) {
    %c0_i32 = arith.constant 0 : i32
    %c0_i32_0 = arith.constant 0 : i32
    %c0_i32_1 = arith.constant 0 : i32
    %c0_i32_2 = arith.constant 0 : i32
    return %c0_i32, %c0_i32_0, %c0_i32_1 : i32, i32, i32
  }
  func.func @transform_4(%arg0: i32) -> (i32, i32) {
    %c0_i32 = arith.constant 0 : i32
    %c0_i32_0 = arith.constant 0 : i32
    %c0_i32_1 = arith.constant 0 : i32
    return %c0_i32, %c0_i32_0 : i32, i32
  }
  func.func @transform_5(%arg0: i32) -> (i32, i32, i32) {
    %c0_i32 = arith.constant 0 : i32
    %c0_i32_0 = arith.constant 0 : i32
    %c0_i32_1 = arith.constant 0 : i32
    return %arg0, %c0_i32, %c0_i32_0 : i32, i32, i32
  }
}

</mosaic_0001>

<bundles_post_ra>
// kernel: tpu_custom_call.1
= control target key start
LH: loop header
LB: loop body
LE: loop exit
PB: predicated region body
PF: predicated region fallthrough
CT: control target
= control target key end

     0   :  { %10 = vsyncpa [#allocation3], 0  ;;  %s4091_s0 = inlined_call_operand.vmem [shape: f32[2,1,256], index: 0, kind: input, shape index: {}]   ;;  %s4092_s1 = inlined_call_operand.vmem [shape: f32[9,32,1], index: 1, kind: input, shape index: {}]   ;;  %s4093_s2 = inlined_call_operand.vmem [shape: f32[32,1], index: 2, kind: input, shape index: {}]   ;;  %s4094_s3 = inlined_call_operand.vmem [shape: f32[9,1,256], index: 3, kind: input, shape index: {}]   ;;  %s4095_s4 = inlined_call_operand.hbm [shape: f32[256,256], index: 4, kind: input, shape index: {}]   ;;  %s4096_s5 = inlined_call_operand.hbm [shape: f32[2,32,64], index: 5, kind: output, shape index: {}]  }
   0x1   :  { %11 = vsyncpa [#allocation4], 0  ;;  %s2463_s18 = smov [#allocation2]   ;;  %s2415_s22 = scalar_lea.hbm %s4095_s4, 8192 }
   0x2   :  { %s25_s19 = sshll.u32 %s2463_s18, 4  ;;  %p2416_p0 = scmp.ne.s32.totalorder %s4095_s4, %s2415_s22  ;;  %s26_s19 = int_to_ptr.vmem [resolvable:$true] %s25_s19 }
   0x3   :  { %p2419_p1 = scmp.lt.u32.totalorder %s2415_s22, %s4095_s4 }
   0x5   :  { %p2421_p2 = pnand %p2419_p1, %p2416_p0 }
   0x7   :  { %2424 = shalt.err (!%p2421_p2)
}
   0x8   :  { %s2425_s27 = scalar_lea.vmem %s26_s19, 8192  ;;  %p2430_p4 = scmp.lt.s32.totalorder %s26_s19, %s26_s19 }
   0x9   :  { %p2426_p3 = scmp.ne.s32.totalorder %s26_s19, %s2425_s27  ;;  %p2431_p5 = scmp.lt.s32.totalorder %s2425_s27, %s2425_s27 }
   0xb   :  { %p2432_p6 = por %p2431_p5, %p2430_p4 }
   0xd   :  { %p2433_p7 = pnand %p2432_p6, %p2426_p3 }
   0xf   :  { %2436 = shalt.err (!%p2433_p7)
}
  0x10   :  { %s2464_s28 = smov 256   ;;  %s2465_s29 = smov 16  }
  0x11   :  { %31 = dma.hbm_to_vmem [thread:$0]  %s4095_s4, 8192, %s26_s19, [#allocation3], %s2464_s28, %s2464_s28, %s2465_s29  }
  0x12   :  { %2459 = dma.done.wait [#allocation3], 8192  }
  0x13   :  { %2460 = vsyncadd [#allocation3], 4294959104  ;;  %v39_v0 = vlaneseq  ;;  %v2466_v1 = vmov 0   ;;  %v93_v5 = vld [vmem:[%s4092_s1 + $0x8] sm:$0xff]  ;;  %v35_v6 = vld [vmem:[%s4091_s0] sm:$0x3] }
  0x14   :  { %2414 = vset.pattern.permute.xlu1 %v2466_v1  ;;  %2413 = vset.pattern.permute.xlu0 %v2466_v1  ;;  %v36_v7 = vld [vmem:[%s4091_s0 + $0x2] sm:$0x3]  ;;  %s2467_s12 = smov 17   ;;  %v94_v13 = vld [vmem:[%s4092_s1 + $0x10] sm:$0xff]  ;;  %v95_v15 = vld [vmem:[%s4092_s1 + $0x18] sm:$0xff]  ;;  %s2468_s20 = smov 1  }
  0x15   :  { %v40_v2 = vshrl.u32 %v39_v0, 7  ;;  %119 = vperm.xlu1 %2414, %v93_v5   ;;  %v92_v12 = vld [vmem:[%s4092_s1] sm:$0xff]  ;;  %v2256_v19 = vld [vmem:[%s4092_s1 + $0x28] sm:$0xff]  ;;  %v2257_v20 = vld [vmem:[%s4092_s1 + $0x30] sm:$0xff]  ;;  %s2469_s7 = smov 2   ;;  %vm63_vm0 = vcmask 138240  }
  0x16   :  { %v2254_v14 = vld [vmem:[%s4094_s3 + $0x2] sm:$0x3]  ;;  %v2259_v21 = vld [vmem:[%s4094_s3 + $0x4] sm:$0x3]  ;;  %v2258_v22 = vld [vmem:[%s4092_s1 + $0x38] sm:$0xff]  ;;  %vm163_vm1 = vcmask 7168  }
  0x17   :  { %v2529_v3 = vsub.s32 0, %v40_v2  ;;  %v2531_v4 = vsub.s32 1, %v40_v2  ;;  %v2255_v18 = vld [vmem:[%s4092_s1 + $0x20] sm:$0xff]  ;;  %v2261_v26 = vld [vmem:[%s4092_s1 + $0x48] sm:$0xff]  ;;  %v2262_v27 = vld [vmem:[%s4092_s1 + $0x50] sm:$0xff]  ;;  %s2470_s17 = smov 127  }
  0x18   :  { %v2260_v25 = vld [vmem:[%s4092_s1 + $0x40] sm:$0xff]  ;;  %v2263_v29 = vld [vmem:[%s4092_s1 + $0x58] sm:$0xff]  ;;  %vm383_vm2 = vcmask 15360   ;;  %s2471_s18 = smov 126   ;;  %vm319_vm3 = vcmask 1039360   ;;  %vm539_vm4 = vcmask 1031168  }
  0x19   :  { %v42_v8 = vrot.slane %v35_v6, %v2529_v3  ;;  %v50_v9 = vrot.slane %v36_v7, %v2529_v3  ;;  %v46_v10 = vrot.slane %v35_v6, %v2531_v4  ;;  %v54_v11 = vrot.slane %v36_v7, %v2531_v4  ;;  %v2593_v28 = vld [vmem:[%s4094_s3 + $0x6] sm:$0x3]  ;;  %s2473_s0 = smov 18   ;;  %s2475_s30 = smov 33  }
  0x1a   :  { %v154_v16 = vrot.slane %v2254_v14, %v2529_v3  ;;  %v158_v17 = vrot.slane %v2254_v14, %v2531_v4  ;;  %v374_v23 = vrot.slane %v2259_v21, %v2529_v3  ;;  %v378_v24 = vrot.slane %v2259_v21, %v2531_v4  ;;  %s2476_s14 = smov 34   ;;  %s2478_s6 = smov 110  }
  0x1b   :  { %55 = vrot.lane.b32.xlu0 %v42_v8, %s2467_s12  ;;  %59 = vrot.lane.b32.xlu1 %v50_v9, %s2467_s12  ;;  %v594_v30 = vrot.slane %v2593_v28, %v2529_v3  ;;  %vm603_vm5 = vcmask 130048   ;;  %vm1042_vm6 = vcmask 146432   ;;  %vm1262_vm7 = vcmask 261120   ;;  %s2480_s10 = smov 95   ;;  %s2481_s4 = smov 94  }
  0x1c   :  { %vm1482_vm8 = vcmask 269312   ;;  %vm1702_vm9 = vcmask 277504   ;;  %vm759_vm10 = vcmask 916480   ;;  %vm978_vm11 = vcmask 908288   ;;  %s2483_s15 = smov [#allocation5]  }
  0x1d   :  { %vm1198_vm12 = vcmask 900096   ;;  %vm1418_vm13 = vcmask 785408   ;;  %vm1638_vm14 = vcmask 777216   ;;  %vm1858_vm15 = vcmask 769024   ;;  %s2242_s16 = sshll.u32 %s2483_s15, 4  ;;  %s2243_s16 = int_to_ptr.vmem [resolvable:$true] %s2242_s16 }
  0x1e   :  { %p2442_p9 = scmp.lt.s32.totalorder %s2243_s16, %s2243_s16 }
  0x1f   :  { %57 = vrot.lane.b32.xlu0 %v46_v10, %s2467_s12  ;;  %61 = vrot.lane.b32.xlu1 %v54_v11, %s2467_s12 }
  0x23   :  { %114 = vperm.xlu0 %2413, %v92_v12   ;;  %124 = vperm.xlu1 %2414, %v94_v13  }
  0x27   :  { %129 = vperm.xlu0 %2413, %v95_v15   ;;  %159 = vrot.lane.b32.xlu1 %v154_v16, %s2468_s20 }
  0x2b   :  { %161 = vrot.lane.b32.xlu0 %v158_v17, %s2468_s20  ;;  %205 = vperm.xlu1 %2414, %v2255_v18   ;;  %s2474_s20 = smov 32  }
  0x2f   :  { %210 = vperm.xlu0 %2413, %v2256_v19   ;;  %215 = vperm.xlu1 %2414, %v2257_v20  }
  0x33   :  { %220 = vperm.xlu0 %2413, %v2258_v22   ;;  %379 = vrot.lane.b32.xlu1 %v374_v23, %s2469_s7 }
  0x37   :  { %381 = vrot.lane.b32.xlu0 %v378_v24, %s2469_s7  ;;  %425 = vperm.xlu1 %2414, %v2260_v25   ;;  %s2479_s7 = smov 96  }
  0x3b   :  { %430 = vperm.xlu0 %2413, %v2261_v26   ;;  %435 = vperm.xlu1 %2414, %v2262_v27  }
  0x3f   :  { %440 = vperm.xlu0 %2413, %v2263_v29   ;;  %599 = vrot.lane.b32.xlu1 %v594_v30, %s2465_s29 }
  0x8d   :  { %v56_v31 = vpop.permute.xlu0 %55 }
  0x8e   :  { %v2610_v39 = vsel %vm63_vm0, 0.0, %v56_v31 }
  0x91   :  { %v58_v34 = vpop.permute.xlu0 %57 }
  0x92   :  { %v2614_v42 = vsel %vm63_vm0, %v58_v34, 0.0  ;;  %v2617_v44 = vsel %vm63_vm0, %v56_v31, %v58_v34 }
  0x94   :  { %v2601_v32 = vpop.permute.xlu1 %119 }
  0x98   :  { %v60_v33 = vpop.permute.xlu1 %59 }
  0x99   :  { %v2632_v61 = vsel %vm63_vm0, 0.0, %v60_v33 }
  0x9c   :  { %v62_v35 = vpop.permute.xlu1 %61 }
  0x9d   :  { %v2637_v2 = vsel %vm63_vm0, %v60_v33, %v62_v35  ;;  %v2641_v5 = vsel %vm63_vm0, %v62_v35, 0.0 }
  0xa2   :  { %v2603_v36 = vpop.permute.xlu0 %114  ;;  %v2605_v37 = vpop.permute.xlu1 %124 }
  0xa3   :  { %4126 = vst [vmem:[#allocation8_spill] sm:$0xff] %v2603_v36  ;;  %v1973_v36 = vld [vmem:[#allocation2 + $0x50] sm:$0xff] }
  0xa6   :  { %v2607_v38 = vpop.permute.xlu0 %129  ;;  %v160_v40 = vpop.permute.xlu1 %159 }
  0xa7   :  { %v168_v41 = vmul.f32 %v160_v40, %v2610_v39  ;;  %v171_v63 = vmul.f32 %v160_v40, %v2632_v61 }
  0xa9   :  { %v182_v45 = vrot.slane %v168_v41, %v2529_v3  ;;  %v194_v8 = vrot.slane %v171_v63, %v2529_v3 }
  0xaa   :  { %v162_v43 = vpop.permute.xlu0 %161  ;;  %v206_v49 = vpop.permute.xlu1 %205 }
  0xab   :  { %v164_v46 = vsel %vm163_vm1, %v160_v40, %v162_v43  ;;  %v170_v47 = vmul.f32 %v162_v43, %v2614_v42  ;;  %v223_v51 = vmul.f32 %v206_v49, %v182_v45  ;;  %v173_v9 = vmul.f32 %v162_v43, %v2641_v5 }
  0xac   :  { %v169_v48 = vmul.f32 %v164_v46, %v2617_v44  ;;  %v172_v6 = vmul.f32 %v164_v46, %v2637_v2  ;;  %v235_v14 = vmul.f32 %v206_v49, %v194_v8 }
  0xad   :  { %v190_v50 = vrot.slane %v170_v47, %v2529_v3  ;;  %271 = vrot.lane.b32.xlu1 %v223_v51, %s2470_s17  ;;  %v202_v13 = vrot.slane %v173_v9, %v2529_v3 }
  0xae   :  { %v186_v52 = vrot.slane %v169_v48, %v2529_v3  ;;  %v211_v54 = vpop.permute.xlu0 %210  ;;  %v216_v58 = vpop.permute.xlu1 %215  ;;  %v198_v11 = vrot.slane %v172_v6, %v2529_v3 }
  0xaf   :  { %v225_v55 = vmul.f32 %v206_v49, %v190_v50  ;;  %v226_v56 = vmul.f32 %v211_v54, %v182_v45  ;;  %v228_v59 = vmul.f32 %v211_v54, %v190_v50  ;;  %v229_v60 = vmul.f32 %v216_v58, %v182_v45 }
  0xb0   :  { %v224_v53 = vmul.f32 %v206_v49, %v186_v52  ;;  %v227_v57 = vmul.f32 %v211_v54, %v186_v52  ;;  %v230_v62 = vmul.f32 %v216_v58, %v186_v52  ;;  %v231_v1 = vmul.f32 %v216_v58, %v190_v50 }
  0xb1   :  { %275 = vrot.lane.b32.xlu1 %v225_v55, %s2470_s17  ;;  %v236_v15 = vmul.f32 %v206_v49, %v198_v11  ;;  %v237_v16 = vmul.f32 %v206_v49, %v202_v13  ;;  %v238_v17 = vmul.f32 %v211_v54, %v194_v8  ;;  %v239_v18 = vmul.f32 %v211_v54, %v198_v11 }
  0xb2   :  { %273 = vrot.lane.b32.xlu0 %v224_v53, %s2470_s17  ;;  %v221_v0 = vpop.permute.xlu0 %220  ;;  %v240_v19 = vmul.f32 %v211_v54, %v202_v13  ;;  %v241_v20 = vmul.f32 %v216_v58, %v194_v8  ;;  %v380_v21 = vpop.permute.xlu1 %379  ;;  %v242_v23 = vmul.f32 %v216_v58, %v198_v11  ;;  %v243_v26 = vmul.f32 %v216_v58, %v202_v13 }
  0xb3   :  { %v232_v7 = vmul.f32 %v221_v0, %v182_v45  ;;  %v233_v10 = vmul.f32 %v221_v0, %v186_v52  ;;  %v234_v12 = vmul.f32 %v221_v0, %v190_v50  ;;  %v388_v24 = vmul.f32 %v380_v21, %v2610_v39 }
  0xb4   :  { %v244_v29 = vmul.f32 %v221_v0, %v194_v8  ;;  %v245_v33 = vmul.f32 %v221_v0, %v198_v11  ;;  %v246_v40 = vmul.f32 %v221_v0, %v202_v13  ;;  %v391_v54 = vmul.f32 %v380_v21, %v2632_v61 }
  0xb5   :  { %279 = vrot.lane.b32.xlu1 %v227_v57, %s2470_s17  ;;  %v402_v30 = vrot.slane %v388_v24, %v2529_v3 }
  0xb6   :  { %277 = vrot.lane.b32.xlu0 %v226_v56, %s2470_s17  ;;  %v382_v22 = vpop.permute.xlu0 %381  ;;  %v426_v34 = vpop.permute.xlu1 %425 }
  0xb7   :  { %v384_v25 = vsel %vm383_vm2, %v380_v21, %v382_v22  ;;  %v390_v31 = vmul.f32 %v382_v22, %v2614_v42  ;;  %v443_v43 = vmul.f32 %v426_v34, %v402_v30  ;;  %v2266_v21 = vld [vmem:[%s4092_s1 + $0x68] sm:$0xff] }
  0xb8   :  { %v389_v27 = vmul.f32 %v384_v25, %v2617_v44  ;;  %v392_v57 = vmul.f32 %v384_v25, %v2637_v2 }
  0xb9   :  { %283 = vrot.lane.b32.xlu1 %v229_v60, %s2470_s17  ;;  %v410_v41 = vrot.slane %v390_v31, %v2529_v3  ;;  %v393_v60 = vmul.f32 %v382_v22, %v2641_v5  ;;  %v2268_v22 = vld [vmem:[%s4092_s1 + $0x78] sm:$0xff] }
  0xba   :  { %281 = vrot.lane.b32.xlu0 %v228_v59, %s2470_s17  ;;  %v406_v35 = vrot.slane %v389_v27, %v2529_v3  ;;  %v431_v46 = vpop.permute.xlu0 %430  ;;  %v436_v50 = vpop.permute.xlu1 %435  ;;  %v414_v59 = vrot.slane %v391_v54, %v2529_v3  ;;  %v418_v63 = vrot.slane %v392_v57, %v2529_v3 }
  0xbb   :  { %v445_v47 = vmul.f32 %v426_v34, %v410_v41  ;;  %v446_v48 = vmul.f32 %v431_v46, %v402_v30  ;;  %v448_v51 = vmul.f32 %v431_v46, %v410_v41  ;;  %v449_v52 = vmul.f32 %v436_v50, %v402_v30 }
  0xbc   :  { %v444_v45 = vmul.f32 %v426_v34, %v406_v35  ;;  %v447_v49 = vmul.f32 %v431_v46, %v406_v35  ;;  %v450_v53 = vmul.f32 %v436_v50, %v406_v35  ;;  %v451_v56 = vmul.f32 %v436_v50, %v410_v41 }
  0xbd   :  { %287 = vrot.lane.b32.xlu1 %v231_v1, %s2470_s17  ;;  %v422_v1 = vrot.slane %v393_v60, %v2529_v3  ;;  %v455_v6 = vmul.f32 %v426_v34, %v414_v59  ;;  %v458_v9 = vmul.f32 %v431_v46, %v414_v59  ;;  %v462_v13 = vmul.f32 %v436_v50, %v418_v63 }
  0xbe   :  { %285 = vrot.lane.b32.xlu0 %v230_v62, %s2470_s17  ;;  %v441_v55 = vpop.permute.xlu0 %440 }
  0xbf   :  { %v452_v58 = vmul.f32 %v441_v55, %v402_v30  ;;  %v453_v62 = vmul.f32 %v441_v55, %v406_v35  ;;  %v454_v0 = vmul.f32 %v441_v55, %v410_v41  ;;  %v457_v8 = vmul.f32 %v426_v34, %v422_v1 }
  0xc0   :  { %v460_v11 = vmul.f32 %v431_v46, %v422_v1 }
  0xc1   :  { %291 = vrot.lane.b32.xlu1 %v233_v10, %s2470_s17  ;;  %v459_v10 = vmul.f32 %v431_v46, %v418_v63 }
  0xc2   :  { %289 = vrot.lane.b32.xlu0 %v232_v7, %s2470_s17  ;;  %v456_v7 = vmul.f32 %v426_v34, %v418_v63 }
  0xc5   :  { %295 = vrot.lane.b32.xlu1 %v235_v14, %s2470_s17  ;;  %v463_v14 = vmul.f32 %v436_v50, %v422_v1 }
  0xc6   :  { %293 = vrot.lane.b32.xlu0 %v234_v12, %s2470_s17  ;;  %v461_v12 = vmul.f32 %v436_v50, %v414_v59 }
  0xc9   :  { %299 = vrot.lane.b32.xlu1 %v237_v16, %s2470_s17  ;;  %v465_v16 = vmul.f32 %v441_v55, %v418_v63 }
  0xca   :  { %297 = vrot.lane.b32.xlu0 %v236_v15, %s2470_s17  ;;  %v464_v15 = vmul.f32 %v441_v55, %v414_v59 }
  0xcd   :  { %303 = vrot.lane.b32.xlu1 %v239_v18, %s2470_s17  ;;  %v2265_v18 = vld [vmem:[%s4092_s1 + $0x60] sm:$0xff] }
  0xce   :  { %301 = vrot.lane.b32.xlu0 %v238_v17, %s2470_s17  ;;  %v466_v17 = vmul.f32 %v441_v55, %v422_v1 }
  0xd1   :  { %307 = vrot.lane.b32.xlu1 %v241_v20, %s2470_s17  ;;  %v2267_v20 = vld [vmem:[%s4092_s1 + $0x70] sm:$0xff] }
  0xd2   :  { %305 = vrot.lane.b32.xlu0 %v240_v19, %s2470_s17  ;;  %v598_v19 = vrot.slane %v2593_v28, %v2531_v4  ;;  %v76_v28 = vld [vmem:[%s4094_s3] sm:$0x3] }
  0xd3   :  { %v81_v24 = vrot.slane %v76_v28, %v2529_v3 }
  0xd5   :  { %311 = vrot.lane.b32.xlu1 %v243_v26, %s2470_s17  ;;  %v85_v26 = vrot.slane %v76_v28, %v2531_v4  ;;  %v88_v27 = vmul.f32 %v81_v24, %v2610_v39 }
  0xd6   :  { %309 = vrot.lane.b32.xlu0 %v242_v23, %s2470_s17  ;;  %v2717_v23 = vpop.permute.xlu1 %599 }
  0xd7   :  { %v89_v31 = vmul.f32 %v85_v26, %v2617_v44 }
  0xd9   :  { %315 = vrot.lane.b32.xlu1 %v245_v33, %s2470_s17  ;;  %v2730_v33 = vrot.slane %v88_v27, %v2529_v3  ;;  %v2735_v41 = vrot.slane %v89_v31, %v2529_v3 }
  0xda   :  { %313 = vrot.lane.b32.xlu0 %v244_v29, %s2470_s17 }
  0xdb   :  { %4130 = vst [vmem:[#allocation12_spill] sm:$0xff] %v2730_v33  ;;  %v134_v35 = vmul.f32 %v2601_v32, %v2730_v33  ;;  %4131 = vst [vmem:[#allocation13_spill] sm:$0xff] %v2735_v41  ;;  %v135_v46 = vmul.f32 %v2601_v32, %v2735_v41  ;;  %v137_v54 = vmul.f32 %v2605_v37, %v2735_v41 }
  0xdc   :  { %v138_v60 = vmul.f32 %v2607_v38, %v2730_v33  ;;  %v139_v1 = vmul.f32 %v2607_v38, %v2735_v41  ;;  %v1975_v41 = vld [vmem:[#allocation2 + $0x60] sm:$0xff] }
  0xdd   :  { %491 = vrot.lane.b32.xlu1 %v443_v43, %s2471_s18 }
  0xde   :  { %317 = vrot.lane.b32.xlu0 %v246_v40, %s2470_s17 }
  0xe1   :  { %495 = vrot.lane.b32.xlu1 %v445_v47, %s2471_s18 }
  0xe2   :  { %493 = vrot.lane.b32.xlu0 %v444_v45, %s2471_s18 }
  0xe5   :  { %499 = vrot.lane.b32.xlu1 %v447_v49, %s2471_s18 }
  0xe6   :  { %497 = vrot.lane.b32.xlu0 %v446_v48, %s2471_s18 }
  0xe9   :  { %503 = vrot.lane.b32.xlu1 %v449_v52, %s2471_s18 }
  0xea   :  { %501 = vrot.lane.b32.xlu0 %v448_v51, %s2471_s18  ;;  %v136_v51 = vmul.f32 %v2605_v37, %v2730_v33 }
  0xed   :  { %507 = vrot.lane.b32.xlu1 %v451_v56, %s2471_s18 }
  0xee   :  { %505 = vrot.lane.b32.xlu0 %v450_v53, %s2471_s18 }
  0xf1   :  { %511 = vrot.lane.b32.xlu1 %v453_v62, %s2471_s18 }
  0xf2   :  { %509 = vrot.lane.b32.xlu0 %v452_v58, %s2471_s18 }
  0xf5   :  { %515 = vrot.lane.b32.xlu1 %v455_v6, %s2471_s18 }
  0xf6   :  { %513 = vrot.lane.b32.xlu0 %v454_v0, %s2471_s18 }
  0xf9   :  { %519 = vrot.lane.b32.xlu1 %v457_v8, %s2471_s18 }
  0xfa   :  { %517 = vrot.lane.b32.xlu0 %v456_v7, %s2471_s18 }
  0xfd   :  { %523 = vrot.lane.b32.xlu1 %v459_v10, %s2471_s18 }
  0xfe   :  { %521 = vrot.lane.b32.xlu0 %v458_v9, %s2471_s18  ;;  %v90_v9 = vmul.f32 %v81_v24, %v2632_v61 }
 0x101   :  { %527 = vrot.lane.b32.xlu1 %v461_v12, %s2471_s18  ;;  %v91_v12 = vmul.f32 %v85_v26, %v2637_v2 }
 0x102   :  { %525 = vrot.lane.b32.xlu0 %v460_v11, %s2471_s18 }
 0x105   :  { %531 = vrot.lane.b32.xlu1 %v463_v14, %s2471_s18 }
 0x106   :  { %529 = vrot.lane.b32.xlu0 %v462_v13, %s2471_s18  ;;  %v2764_v13 = vrot.slane %v90_v9, %v2529_v3 }
 0x108   :  { %4134 = vst [vmem:[#allocation16_spill] sm:$0xff] %v2764_v13  ;;  %v144_v27 = vmul.f32 %v2605_v37, %v2764_v13 }
 0x109   :  { %535 = vrot.lane.b32.xlu1 %v465_v16, %s2471_s18 }
 0x10a   :  { %533 = vrot.lane.b32.xlu0 %v464_v15, %s2471_s18  ;;  %v2769_v15 = vrot.slane %v91_v12, %v2529_v3 }
 0x10c   :  { %4136 = vst [vmem:[#allocation18_spill] sm:$0xff] %v2769_v15 }
 0x10d   :  { %645 = vperm.xlu1 %2414, %v2265_v18  }
 0x10e   :  { %537 = vrot.lane.b32.xlu0 %v466_v17, %s2471_s18  ;;  %v142_v17 = vmul.f32 %v2601_v32, %v2764_v13 }
 0x111   :  { %655 = vperm.xlu1 %2414, %v2267_v20  }
 0x112   :  { %601 = vrot.lane.b32.xlu0 %v598_v19, %s2465_s29  ;;  %s2472_s29 = smov 112  }
 0x116   :  { %650 = vperm.xlu0 %2413, %v2266_v21   ;;  %v143_v21 = vmul.f32 %v2601_v32, %v2769_v15 }
 0x11a   :  { %660 = vperm.xlu0 %2413, %v2268_v22  }
 0x11f   :  { %v2720_v25 = vpop.permute.xlu1 %271 }
 0x120   :  { %4127 = vst [vmem:[#allocation9_spill] sm:$0xff] %v2720_v25 }
 0x123   :  { %v2726_v30 = vpop.permute.xlu1 %275 }
 0x124   :  { %v2724_v29 = vpop.permute.xlu0 %273  ;;  %4129 = vst [vmem:[#allocation11_spill] sm:$0xff] %v2726_v30  ;;  %v1980_v30 = vld [vmem:[#allocation2 + $0x88] sm:$0xff] }
 0x125   :  { %4128 = vst [vmem:[#allocation10_spill] sm:$0xff] %v2724_v29  ;;  %v1977_v29 = vld [vmem:[#allocation2 + $0x70] sm:$0xff] }
 0x127   :  { %v280_v40 = vpop.permute.xlu1 %279 }
 0x128   :  { %v278_v34 = vpop.permute.xlu0 %277 }
 0x129   :  { %v322_v43 = vsel %vm319_vm3, %v278_v34, %v280_v40 }
 0x12a   :  { %v2738_v45 = vadd.f32 %v322_v43, %v134_v35  ;;  %v145_v35 = vmul.f32 %v2605_v37, %v2769_v15 }
 0x12b   :  { %v284_v49 = vpop.permute.xlu1 %283 }
 0x12c   :  { %v282_v47 = vpop.permute.xlu0 %281 }
 0x12d   :  { %v323_v48 = vsel %vm319_vm3, %v280_v40, %v282_v47 }
 0x12e   :  { %v2743_v50 = vadd.f32 %v323_v48, %v135_v46  ;;  %v146_v48 = vmul.f32 %v2607_v38, %v2764_v13 }
 0x12f   :  { %v288_v55 = vpop.permute.xlu1 %287 }
 0x130   :  { %v286_v52 = vpop.permute.xlu0 %285 }
 0x131   :  { %v324_v53 = vsel %vm319_vm3, %v284_v49, %v286_v52  ;;  %v325_v57 = vsel %vm319_vm3, %v286_v52, %v288_v55 }
 0x132   :  { %v356_v56 = vadd.f32 %v324_v53, %v136_v51  ;;  %v357_v58 = vadd.f32 %v325_v57, %v137_v54  ;;  %v147_v53 = vmul.f32 %v2607_v38, %v2769_v15 }
 0x133   :  { %v292_v62 = vpop.permute.xlu1 %291 }
 0x134   :  { %v290_v59 = vpop.permute.xlu0 %289 }
 0x135   :  { %v326_v63 = vsel %vm319_vm3, %v290_v59, %v292_v62 }
 0x136   :  { %v358_v0 = vadd.f32 %v326_v63, %v138_v60 }
 0x137   :  { %v2757_v8 = vpop.permute.xlu1 %295 }
 0x138   :  { %v294_v6 = vpop.permute.xlu0 %293  ;;  %4132 = vst [vmem:[#allocation14_spill] sm:$0xff] %v2757_v8 }
 0x139   :  { %v327_v7 = vsel %vm319_vm3, %v292_v62, %v294_v6 }
 0x13a   :  { %v359_v10 = vadd.f32 %v327_v7, %v139_v1 }
 0x13b   :  { %v2766_v14 = vpop.permute.xlu1 %299 }
 0x13c   :  { %v2760_v11 = vpop.permute.xlu0 %297  ;;  %4135 = vst [vmem:[#allocation17_spill] sm:$0xff] %v2766_v14 }
 0x13d   :  { %4133 = vst [vmem:[#allocation15_spill] sm:$0xff] %v2760_v11 }
 0x13f   :  { %v304_v18 = vpop.permute.xlu1 %303 }
 0x140   :  { %v302_v16 = vpop.permute.xlu0 %301 }
 0x141   :  { %v330_v19 = vsel %vm319_vm3, %v302_v16, %v304_v18 }
 0x142   :  { %v362_v20 = vadd.f32 %v330_v19, %v142_v17 }
 0x143   :  { %v308_v24 = vpop.permute.xlu1 %307 }
 0x144   :  { %v306_v22 = vpop.permute.xlu0 %305 }
 0x145   :  { %v331_v28 = vsel %vm319_vm3, %v304_v18, %v306_v22 }
 0x146   :  { %v363_v26 = vadd.f32 %v331_v28, %v143_v21 }
 0x147   :  { %v312_v40 = vpop.permute.xlu1 %311 }
 0x148   :  { %v310_v31 = vpop.permute.xlu0 %309 }
 0x149   :  { %v332_v34 = vsel %vm319_vm3, %v308_v24, %v310_v31  ;;  %v333_v46 = vsel %vm319_vm3, %v310_v31, %v312_v40 }
 0x14a   :  { %v364_v43 = vadd.f32 %v332_v34, %v144_v27  ;;  %v365_v47 = vadd.f32 %v333_v46, %v145_v35 }
 0x14b   :  { %v316_v49 = vpop.permute.xlu1 %315 }
 0x14c   :  { %v314_v32 = vpop.permute.xlu0 %313 }
 0x14d   :  { %v334_v51 = vsel %vm319_vm3, %v314_v32, %v316_v49 }
 0x14e   :  { %v366_v52 = vadd.f32 %v334_v51, %v146_v48 }
 0x14f   :  { %v2789_v37 = vpop.permute.xlu1 %491 }
 0x150   :  { %v318_v54 = vpop.permute.xlu0 %317  ;;  %4137 = vst [vmem:[#allocation19_spill] sm:$0xff] %v2789_v37 }
 0x151   :  { %v335_v55 = vsel %vm319_vm3, %v316_v49, %v318_v54 }
 0x152   :  { %v367_v57 = vadd.f32 %v335_v55, %v147_v53 }
 0x153   :  { %v2793_v60 = vpop.permute.xlu1 %495 }
 0x154   :  { %v2791_v59 = vpop.permute.xlu0 %493  ;;  %4139 = vst [vmem:[#allocation21_spill] sm:$0xff] %v2793_v60 }
 0x155   :  { %4138 = vst [vmem:[#allocation20_spill] sm:$0xff] %v2791_v59  ;;  %v1974_v59 = vld [vmem:[#allocation2 + $0x58] sm:$0xff] }
 0x157   :  { %v500_v63 = vpop.permute.xlu1 %499 }
 0x158   :  { %v498_v62 = vpop.permute.xlu0 %497 }
 0x159   :  { %v542_v1 = vsel %vm539_vm4, %v498_v62, %v500_v63 }
 0x15a   :  { %v2797_v6 = vadd.f32 %v542_v1, %v2738_v45 }
 0x15b   :  { %v504_v9 = vpop.permute.xlu1 %503 }
 0x15c   :  { %4140 = vst [vmem:[#allocation22_spill] sm:$0xff] %v2797_v6  ;;  %v502_v7 = vpop.permute.xlu0 %501 }
 0x15d   :  { %v543_v38 = vsel %vm539_vm4, %v500_v63, %v502_v7 }
 0x15e   :  { %v2801_v12 = vadd.f32 %v543_v38, %v2743_v50 }
 0x15f   :  { %v508_v18 = vpop.permute.xlu1 %507 }
 0x160   :  { %4141 = vst [vmem:[#allocation23_spill] sm:$0xff] %v2801_v12  ;;  %v506_v16 = vpop.permute.xlu0 %505 }
 0x161   :  { %v544_v17 = vsel %vm539_vm4, %v504_v9, %v506_v16  ;;  %v545_v21 = vsel %vm539_vm4, %v506_v16, %v508_v18 }
 0x162   :  { %v2804_v19 = vadd.f32 %v544_v17, %v356_v56  ;;  %v2807_v22 = vadd.f32 %v545_v21, %v357_v58 }
 0x163   :  { %v512_v45 = vpop.permute.xlu1 %511 }
 0x164   :  { %4142 = vst [vmem:[#allocation24_spill] sm:$0xff] %v2804_v19  ;;  %4143 = vst [vmem:[#allocation25_spill] sm:$0xff] %v2807_v22  ;;  %v510_v28 = vpop.permute.xlu0 %509 }
 0x165   :  { %v546_v24 = vsel %vm539_vm4, %v510_v28, %v512_v45 }
 0x166   :  { %v2810_v27 = vadd.f32 %v546_v24, %v358_v0 }
 0x167   :  { %v2813_v34 = vpop.permute.xlu1 %515 }
 0x168   :  { %4144 = vst [vmem:[#allocation26_spill] sm:$0xff] %v2810_v27  ;;  %v514_v31 = vpop.permute.xlu0 %513  ;;  %4145 = vst [vmem:[#allocation27_spill] sm:$0xff] %v2813_v34 }
 0x169   :  { %v547_v50 = vsel %vm539_vm4, %v512_v45, %v514_v31 }
 0x16a   :  { %v2815_v35 = vadd.f32 %v547_v50, %v359_v10 }
 0x16b   :  { %v2819_v56 = vpop.permute.xlu1 %519 }
 0x16c   :  { %4146 = vst [vmem:[#allocation28_spill] sm:$0xff] %v2815_v35  ;;  %v2817_v40 = vpop.permute.xlu0 %517  ;;  %4148 = vst [vmem:[#allocation30_spill] sm:$0xff] %v2819_v56 }
 0x16d   :  { %4147 = vst [vmem:[#allocation29_spill] sm:$0xff] %v2817_v40 }
 0x16f   :  { %v524_v58 = vpop.permute.xlu1 %523 }
 0x170   :  { %v522_v46 = vpop.permute.xlu0 %521 }
 0x171   :  { %v550_v32 = vsel %vm539_vm4, %v522_v46, %v524_v58 }
 0x172   :  { %v2822_v48 = vadd.f32 %v550_v32, %v362_v20  ;;  %v2269_v32 = vld [vmem:[%s4094_s3 + $0x8] sm:$0x3] }
 0x173   :  { %v528_v51 = vpop.permute.xlu1 %527 }
 0x174   :  { %4149 = vst [vmem:[#allocation31_spill] sm:$0xff] %v2822_v48  ;;  %v526_v49 = vpop.permute.xlu0 %525 }
 0x175   :  { %v551_v0 = vsel %vm539_vm4, %v524_v58, %v526_v49 }
 0x176   :  { %v2825_v53 = vadd.f32 %v551_v0, %v363_v26  ;;  %v2270_v0 = vld [vmem:[%s4092_s1 + $0x80] sm:$0xff] }
 0x177   :  { %v532_v55 = vpop.permute.xlu1 %531 }
 0x178   :  { %4150 = vst [vmem:[#allocation32_spill] sm:$0xff] %v2825_v53  ;;  %v530_v54 = vpop.permute.xlu0 %529 }
 0x179   :  { %v552_v10 = vsel %vm539_vm4, %v528_v51, %v530_v54  ;;  %v553_v63 = vsel %vm539_vm4, %v530_v54, %v532_v55  ;;  %v814_v51 = vrot.slane %v2269_v32, %v2529_v3  ;;  %v818_v54 = vrot.slane %v2269_v32, %v2531_v4  ;;  %v2274_v55 = vld [vmem:[%s4094_s3 + $0xa] sm:$0x3] }
 0x17a   :  { %v2828_v62 = vadd.f32 %v552_v10, %v364_v43  ;;  %v2831_v1 = vadd.f32 %v553_v63, %v365_v47  ;;  %v608_v47 = vmul.f32 %v2717_v23, %v2610_v39  ;;  %v2275_v10 = vld [vmem:[%s4092_s1 + $0xa0] sm:$0xff]  ;;  %v2271_v63 = vld [vmem:[%s4092_s1 + $0x88] sm:$0xff] }
 0x17b   :  { %v536_v38 = vpop.permute.xlu1 %535 }
 0x17c   :  { %4151 = vst [vmem:[#allocation33_spill] sm:$0xff] %v2828_v62  ;;  %4152 = vst [vmem:[#allocation34_spill] sm:$0xff] %v2831_v1  ;;  %v534_v7 = vpop.permute.xlu0 %533 }
 0x17d   :  { %v554_v20 = vsel %vm539_vm4, %v534_v7, %v536_v38  ;;  %v1033_v7 = vrot.slane %v2274_v55, %v2529_v3 }
 0x17e   :  { %v2834_v9 = vadd.f32 %v554_v20, %v366_v52  ;;  %v2850_v52 = vrot.slane %v608_v47, %v2529_v3  ;;  %v2280_v20 = vld [vmem:[%s4092_s1 + $0xc0] sm:$0xff] }
 0x180   :  { %4153 = vst [vmem:[#allocation35_spill] sm:$0xff] %v2834_v9  ;;  %v538_v16 = vpop.permute.xlu0 %537 }
 0x181   :  { %v555_v26 = vsel %vm539_vm4, %v536_v38, %v538_v16  ;;  %v1037_v38 = vrot.slane %v2274_v55, %v2531_v4  ;;  %v2279_v16 = vld [vmem:[%s4094_s3 + $0xc] sm:$0x3] }
 0x182   :  { %v2837_v17 = vadd.f32 %v555_v26, %v367_v57  ;;  %v2276_v26 = vld [vmem:[%s4092_s1 + $0xa8] sm:$0xff]  ;;  %v1253_v47 = vrot.slane %v2279_v16, %v2529_v3 }
 0x184   :  { %4154 = vst [vmem:[#allocation36_spill] sm:$0xff] %v2837_v17  ;;  %v2839_v18 = vpop.permute.xlu0 %601 }
 0x185   :  { %v2843_v43 = vsel %vm603_vm5, %v2717_v23, %v2839_v18  ;;  %v610_v57 = vmul.f32 %v2839_v18, %v2614_v42 }
 0x186   :  { %v609_v21 = vmul.f32 %v2843_v43, %v2617_v44 }
 0x187   :  { %v2864_v50 = vrot.slane %v610_v57, %v2529_v3  ;;  %v2285_v57 = vld [vmem:[%s4092_s1 + $0xe0] sm:$0xff] }
 0x188   :  { %v2855_v28 = vrot.slane %v609_v21, %v2529_v3  ;;  %v1257_v21 = vrot.slane %v2279_v16, %v2531_v4  ;;  %v2287_v16 = vld [vmem:[%s4092_s1 + $0xf0] sm:$0xff] }
 0x18c   :  { %v2857_v45 = vpop.permute.xlu1 %645 }
 0x18d   :  { %v663_v24 = vmul.f32 %v2857_v45, %v2850_v52  ;;  %v664_v31 = vmul.f32 %v2857_v45, %v2855_v28  ;;  %v665_v46 = vmul.f32 %v2857_v45, %v2864_v50 }
 0x18f   :  { %711 = vrot.lane.b32.xlu1 %v663_v24, %s2472_s29  ;;  %713 = vrot.lane.b32.xlu0 %v664_v31, %s2472_s29  ;;  %v2272_v24 = vld [vmem:[%s4092_s1 + $0x90] sm:$0xff]  ;;  %v2284_v31 = vld [vmem:[%s4094_s3 + $0xe] sm:$0x3] }
 0x190   :  { %v1473_v32 = vrot.slane %v2284_v31, %v2529_v3 }
 0x193   :  { %715 = vrot.lane.b32.xlu1 %v665_v46, %s2472_s29  ;;  %v2281_v46 = vld [vmem:[%s4092_s1 + $0xc8] sm:$0xff] }
 0x195   :  { %v2871_v58 = vpop.permute.xlu0 %650 }
 0x196   :  { %v666_v49 = vmul.f32 %v2871_v58, %v2850_v52  ;;  %v667_v27 = vmul.f32 %v2871_v58, %v2855_v28 }
 0x197   :  { %864 = vperm.xlu1 %2414, %v2270_v0   ;;  %v2290_v0 = vld [vmem:[%s4092_s1 + $0x100] sm:$0xff] }
 0x198   :  { %717 = vrot.lane.b32.xlu0 %v666_v49, %s2472_s29  ;;  %v1477_v49 = vrot.slane %v2284_v31, %v2531_v4  ;;  %v611_v31 = vmul.f32 %v2717_v23, %v2632_v61 }
 0x19b   :  { %821 = vrot.lane.b32.xlu1 %v818_v54, %s2467_s12  ;;  %v2289_v54 = vld [vmem:[%s4094_s3 + $0x10] sm:$0x3]  ;;  %s2437_s3 = scalar_lea.vmem %s2243_s16, 1024 }
 0x19c   :  { %819 = vrot.lane.b32.xlu0 %v814_v51, %s2467_s12  ;;  %v2277_v51 = vld [vmem:[%s4092_s1 + $0xb0] sm:$0xff]  ;;  %v1693_v55 = vrot.slane %v2289_v54, %v2529_v3  ;;  %p2438_p8 = scmp.ne.s32.totalorder %s2243_s16, %s2437_s3  ;;  %p2443_p10 = scmp.lt.s32.totalorder %s2437_s3, %s2437_s3 }
 0x19e   :  { %p2444_p11 = por %p2443_p10, %p2442_p9 }
 0x19f   :  { %869 = vperm.xlu1 %2414, %v2271_v63   ;;  %v1697_v63 = vrot.slane %v2289_v54, %v2531_v4  ;;  %v2278_v4 = vld [vmem:[%s4092_s1 + $0xb8] sm:$0xff]  ;;  %v2989_v54 = vpop.permute.xlu0 %660 }
 0x1a0   :  { %1084 = vperm.xlu0 %2413, %v2275_v10   ;;  %v2286_v10 = vld [vmem:[%s4092_s1 + $0xe8] sm:$0xff]  ;;  %p2445_p12 = pnand %p2444_p11, %p2438_p8 }
 0x1a3   :  { %1040 = vrot.lane.b32.xlu1 %v1037_v38, %s2473_s0  ;;  %v2282_v38 = vld [vmem:[%s4092_s1 + $0xd0] sm:$0xff] }
 0x1a4   :  { %1038 = vrot.lane.b32.xlu0 %v1033_v7, %s2473_s0  ;;  %v2273_v7 = vld [vmem:[%s4092_s1 + $0x98] sm:$0xff] }
 0x1a7   :  { %1089 = vperm.xlu1 %2414, %v2276_v26   ;;  %v2283_v26 = vld [vmem:[%s4092_s1 + $0xd8] sm:$0xff] }
 0x1a8   :  { %1304 = vperm.xlu0 %2413, %v2280_v20   ;;  %v2291_v20 = vld [vmem:[%s4092_s1 + $0x108] sm:$0xff] }
 0x1ab   :  { %1260 = vrot.lane.b32.xlu1 %v1257_v21, %s2474_s20  ;;  %v2292_v21 = vld [vmem:[%s4092_s1 + $0x110] sm:$0xff] }
 0x1ac   :  { %1258 = vrot.lane.b32.xlu0 %v1253_v47, %s2474_s20  ;;  %v612_v47 = vmul.f32 %v2843_v43, %v2637_v2  ;;  %v2293_v43 = vld [vmem:[%s4092_s1 + $0x118] sm:$0xff] }
 0x1af   :  { %874 = vperm.xlu1 %2414, %v2272_v24   ;;  %v613_v24 = vmul.f32 %v2839_v18, %v2641_v5  ;;  %v2978_v18 = vrot.slane %v611_v31, %v2529_v3 }
 0x1b0   :  { %1524 = vperm.xlu0 %2413, %v2285_v57   ;;  %v2288_v57 = vld [vmem:[%s4092_s1 + $0xf8] sm:$0xff]  ;;  %s2477_s1 = smov 111  }
 0x1b3   :  { %1478 = vrot.lane.b32.xlu1 %v1473_v32, %s2475_s30 }
 0x1b4   :  { %1309 = vperm.xlu0 %2413, %v2281_v46   ;;  %v2967_v46 = vrot.slane %v612_v47, %v2529_v3 }
 0x1b6   :  { %v676_v32 = vmul.f32 %v2857_v45, %v2967_v46  ;;  %v679_v17 = vmul.f32 %v2871_v58, %v2967_v46 }
 0x1b7   :  { %1744 = vperm.xlu1 %2414, %v2290_v0   ;;  %v675_v0 = vmul.f32 %v2857_v45, %v2978_v18 }
 0x1b8   :  { %1480 = vrot.lane.b32.xlu0 %v1477_v49, %s2475_s30  ;;  %v2975_v49 = vrot.slane %v613_v24, %v2529_v3 }
 0x1ba   :  { %v677_v23 = vmul.f32 %v2857_v45, %v2975_v49 }
 0x1bb   :  { %1529 = vperm.xlu1 %2414, %v2286_v10  }
 0x1bc   :  { %1094 = vperm.xlu0 %2413, %v2277_v51   ;;  %v2987_v51 = vpop.permute.xlu1 %655 }
 0x1bf   :  { %1700 = vrot.lane.b32.xlu1 %v1697_v63, %s2476_s14 }
 0x1c0   :  { %1698 = vrot.lane.b32.xlu0 %v1693_v55, %s2476_s14 }
 0x1c3   :  { %1314 = vperm.xlu1 %2414, %v2282_v38  }
 0x1c4   :  { %879 = vperm.xlu0 %2413, %v2273_v7  }
 0x1c7   :  { %1099 = vperm.xlu1 %2414, %v2278_v4  }
 0x1c8   :  { %1749 = vperm.xlu0 %2413, %v2291_v20  }
 0x1cb   :  { %1319 = vperm.xlu1 %2414, %v2283_v26  }
 0x1cc   :  { %1534 = vperm.xlu0 %2413, %v2287_v16  }
 0x1cf   :  { %1539 = vperm.xlu1 %2414, %v2288_v57  }
 0x1d0   :  { %1754 = vperm.xlu0 %2413, %v2292_v21  }
 0x1d3   :  { %737 = vrot.lane.b32.xlu1 %v676_v32, %s2472_s29 }
 0x1d4   :  { %1759 = vperm.xlu0 %2413, %v2293_v43  }
 0x1d7   :  { %735 = vrot.lane.b32.xlu1 %v675_v0, %s2472_s29 }
 0x1d8   :  { %739 = vrot.lane.b32.xlu0 %v677_v23, %s2472_s29 }
 0x201   :  { %v2991_v10 = vpop.permute.xlu1 %711  ;;  %v2993_v55 = vpop.permute.xlu0 %713 }
 0x202   :  { %4155 = vst [vmem:[#allocation37_spill] sm:$0xff] %v2991_v10  ;;  %4156 = vst [vmem:[#allocation38_spill] sm:$0xff] %v2993_v55 }
 0x205   :  { %v2995_v63 = vpop.permute.xlu1 %715 }
 0x206   :  { %4157 = vst [vmem:[#allocation39_spill] sm:$0xff] %v2995_v63 }
 0x20a   :  { %v2997_v7 = vpop.permute.xlu0 %717 }
 0x20b   :  { %4158 = vst [vmem:[#allocation40_spill] sm:$0xff] %v2997_v7 }
 0x20e   :  { %v820_v20 = vpop.permute.xlu0 %819 }
 0x216   :  { %v865_v38 = vpop.permute.xlu1 %864 }
 0x21a   :  { %v822_v4 = vpop.permute.xlu1 %821 }
 0x21b   :  { %v823_v45 = vsel %vm63_vm0, %v820_v20, %v822_v4  ;;  %v829_v16 = vmul.f32 %v822_v4, %v2614_v42  ;;  %v832_v26 = vmul.f32 %v822_v4, %v2641_v5  ;;  %vm2228_vm0 = vcmask 523264  }
 0x21c   :  { %v828_v47 = vmul.f32 %v823_v45, %v2617_v44  ;;  %v831_v21 = vmul.f32 %v823_v45, %v2637_v2  ;;  %v830_v45 = vmul.f32 %v820_v20, %v2632_v61 }
 0x21d   :  { %v3005_v57 = vrot.slane %v829_v16, %v2529_v3  ;;  %v3011_v31 = vrot.slane %v832_v26, %v2529_v3  ;;  %v827_v16 = vmul.f32 %v820_v20, %v2610_v39 }
 0x21e   :  { %v3008_v24 = vrot.slane %v828_v47, %v2529_v3  ;;  %v3015_v32 = vrot.slane %v831_v21, %v2529_v3  ;;  %v3019_v0 = vpop.permute.xlu1 %869  ;;  %v3029_v21 = vrot.slane %v830_v45, %v2529_v3 }
 0x21f   :  { %v884_v43 = vmul.f32 %v865_v38, %v3005_v57  ;;  %v3017_v23 = vpop.permute.xlu0 %1084  ;;  %v896_v26 = vmul.f32 %v865_v38, %v3011_v31  ;;  %v3033_v53 = vrot.slane %v827_v16, %v2529_v3  ;;  %v668_v16 = vmul.f32 %v2871_v58, %v2864_v50 }
 0x220   :  { %v883_v4 = vmul.f32 %v865_v38, %v3008_v24  ;;  %v895_v47 = vmul.f32 %v865_v38, %v3015_v32  ;;  %v894_v20 = vmul.f32 %v865_v38, %v3029_v21  ;;  %v887_v19 = vmul.f32 %v3019_v0, %v3005_v57 }
 0x221   :  { %934 = vrot.lane.b32.xlu1 %v884_v43, %s2477_s1  ;;  %v882_v43 = vmul.f32 %v865_v38, %v3033_v53  ;;  %v897_v6 = vmul.f32 %v3019_v0, %v3029_v21 }
 0x222   :  { %932 = vrot.lane.b32.xlu0 %v883_v4, %s2477_s1  ;;  %v1041_v9 = vpop.permute.xlu1 %1040 }
 0x223   :  { %v1039_v12 = vpop.permute.xlu0 %1038  ;;  %v1049_v45 = vmul.f32 %v1041_v9, %v2614_v42  ;;  %v1052_v38 = vmul.f32 %v1041_v9, %v2641_v5 }
 0x224   :  { %v1043_v4 = vsel %vm1042_vm6, %v1039_v12, %v1041_v9  ;;  %v1050_v22 = vmul.f32 %v1039_v12, %v2632_v61 }
 0x225   :  { %958 = vrot.lane.b32.xlu1 %v896_v26, %s2477_s1  ;;  %v1048_v26 = vmul.f32 %v1043_v4, %v2617_v44  ;;  %v3064_v9 = vrot.slane %v1052_v38, %v2529_v3 }
 0x226   :  { %956 = vrot.lane.b32.xlu0 %v895_v47, %s2477_s1  ;;  %v3050_v47 = vrot.slane %v1049_v45, %v2529_v3 }
 0x227   :  { %v3056_v1 = vrot.slane %v1048_v26, %v2529_v3  ;;  %v3066_v45 = vpop.permute.xlu0 %1304  ;;  %v1116_v38 = vmul.f32 %v3017_v23, %v3064_v9 }
 0x229   :  { %954 = vrot.lane.b32.xlu1 %v894_v20, %s2477_s1  ;;  %v680_v20 = vmul.f32 %v2871_v58, %v2975_v49 }
 0x22a   :  { %930 = vrot.lane.b32.xlu0 %v882_v43, %s2477_s1  ;;  %v1051_v43 = vmul.f32 %v1043_v4, %v2637_v2  ;;  %v1104_v4 = vmul.f32 %v3017_v23, %v3050_v47 }
 0x22b   :  { %v1259_v35 = vpop.permute.xlu0 %1258 }
 0x22c   :  { %v3073_v26 = vrot.slane %v1051_v43, %v2529_v3 }
 0x22d   :  { %721 = vrot.lane.b32.xlu1 %v668_v16, %s2472_s29  ;;  %v3068_v16 = vpop.permute.xlu1 %1089 }
 0x22e   :  { %719 = vrot.lane.b32.xlu0 %v667_v27, %s2472_s29  ;;  %v1047_v27 = vmul.f32 %v1039_v12, %v2610_v39  ;;  %v1115_v43 = vmul.f32 %v3017_v23, %v3073_v26  ;;  %v678_v12 = vmul.f32 %v2871_v58, %v2978_v18  ;;  %v1107_v34 = vmul.f32 %v3068_v16, %v3050_v47 }
 0x22f   :  { %v1106_v37 = vmul.f32 %v3068_v16, %v3056_v1  ;;  %v1119_v40 = vmul.f32 %v3068_v16, %v3064_v9 }
 0x231   :  { %745 = vrot.lane.b32.xlu1 %v680_v20, %s2472_s29  ;;  %v1103_v20 = vmul.f32 %v3017_v23, %v3056_v1  ;;  %v1261_v62 = vpop.permute.xlu1 %1260 }
 0x232   :  { %743 = vrot.lane.b32.xlu0 %v679_v17, %s2472_s29  ;;  %v3080_v17 = vrot.slane %v1047_v27, %v2529_v3  ;;  %v3092_v27 = vrot.slane %v1050_v22, %v2529_v3 }
 0x235   :  { %1154 = vrot.lane.b32.xlu1 %v1104_v4, %s2478_s6  ;;  %v1102_v4 = vmul.f32 %v3017_v23, %v3080_v17 }
 0x236   :  { %1152 = vrot.lane.b32.xlu0 %v1103_v20, %s2478_s6  ;;  %v1263_v20 = vsel %vm1262_vm7, %v1259_v35, %v1261_v62 }
 0x237   :  { %v1268_v48 = vmul.f32 %v1263_v20, %v2617_v44  ;;  %v1271_v22 = vmul.f32 %v1263_v20, %v2637_v2 }
 0x239   :  { %1178 = vrot.lane.b32.xlu1 %v1116_v38, %s2478_s6  ;;  %v886_v38 = vmul.f32 %v3019_v0, %v3008_v24  ;;  %v3107_v58 = vrot.slane %v1268_v48, %v2529_v3  ;;  %v1272_v48 = vmul.f32 %v1261_v62, %v2641_v5 }
 0x23a   :  { %1176 = vrot.lane.b32.xlu0 %v1115_v43, %s2478_s6  ;;  %v1114_v43 = vmul.f32 %v3017_v23, %v3092_v27  ;;  %v3117_v23 = vrot.slane %v1271_v22, %v2529_v3 }
 0x23b   :  { %v1323_v20 = vmul.f32 %v3066_v45, %v3107_v58  ;;  %v3132_v22 = vrot.slane %v1272_v48, %v2529_v3  ;;  %v3145_v48 = vpop.permute.xlu0 %1524 }
 0x23d   :  { %1150 = vrot.lane.b32.xlu1 %v1102_v4, %s2478_s6  ;;  %v898_v4 = vmul.f32 %v3019_v0, %v3015_v32 }
 0x23e   :  { %741 = vrot.lane.b32.xlu0 %v678_v12, %s2472_s29  ;;  %v1269_v12 = vmul.f32 %v1261_v62, %v2614_v42 }
 0x241   :  { %938 = vrot.lane.b32.xlu1 %v886_v38, %s2477_s1  ;;  %v3123_v38 = vrot.slane %v1269_v12, %v2529_v3  ;;  %v1270_v12 = vmul.f32 %v1259_v35, %v2632_v61 }
 0x242   :  { %1174 = vrot.lane.b32.xlu0 %v1114_v43, %s2478_s6  ;;  %v899_v43 = vmul.f32 %v3019_v0, %v3011_v31 }
 0x243   :  { %v1324_v62 = vmul.f32 %v3066_v45, %v3123_v38 }
 0x245   :  { %962 = vrot.lane.b32.xlu1 %v898_v4, %s2477_s1  ;;  %v1907_v4 = vld [vmem:[%s4093_s2] sm:$0xff] }
 0x246   :  { %940 = vrot.lane.b32.xlu0 %v887_v19, %s2477_s1  ;;  %v1335_v19 = vmul.f32 %v3066_v45, %v3117_v23 }
 0x249   :  { %1372 = vrot.lane.b32.xlu1 %v1323_v20, %s2479_s7  ;;  %v1267_v20 = vmul.f32 %v1259_v35, %v2610_v39  ;;  %v885_v35 = vmul.f32 %v3019_v0, %v3033_v53  ;;  %v671_v0 = vmul.f32 %v2987_v51, %v2864_v50 }
 0x24a   :  { %964 = vrot.lane.b32.xlu0 %v899_v43, %s2477_s1  ;;  %v1336_v43 = vmul.f32 %v3066_v45, %v3132_v22 }
 0x24b   :  { %v3156_v7 = vrot.slane %v1267_v20, %v2529_v3 }
 0x24d   :  { %1396 = vrot.lane.b32.xlu1 %v1335_v19, %s2479_s7  ;;  %v3149_v19 = vrot.slane %v1270_v12, %v2529_v3  ;;  %v3164_v12 = vpop.permute.xlu0 %1309 }
 0x24e   :  { %1374 = vrot.lane.b32.xlu0 %v1324_v62, %s2479_s7  ;;  %v3151_v62 = vpop.permute.xlu1 %874 }
 0x251   :  { %1913 = vperm.xlu1 %2414, %v1907_v4   ;;  %v1334_v4 = vmul.f32 %v3066_v45, %v3149_v19  ;;  %v1481_v20 = vpop.permute.xlu0 %1480 }
 0x252   :  { %1398 = vrot.lane.b32.xlu0 %v1336_v43, %s2479_s7  ;;  %v1322_v43 = vmul.f32 %v3066_v45, %v3156_v7  ;;  %v3168_v10 = vpop.permute.xlu1 %1478  ;;  %v683_v45 = vmul.f32 %v2987_v51, %v2975_v49  ;;  %v1492_v25 = vmul.f32 %v1481_v20, %v2641_v5 }
 0x254   :  { %v3214_v63 = vrot.slane %v1492_v25, %v2529_v3  ;;  %v1967_v25 = vld [vmem:[#allocation2 + $0x20] sm:$0xff] }
 0x255   :  { %960 = vrot.lane.b32.xlu1 %v897_v6, %s2477_s1  ;;  %v670_v6 = vmul.f32 %v2987_v51, %v2855_v28  ;;  %v3196_v8 = vpop.permute.xlu0 %1094 }
 0x256   :  { %936 = vrot.lane.b32.xlu0 %v885_v35, %s2477_s1  ;;  %v3178_v35 = vpop.permute.xlu1 %1744  ;;  %4161 = vst [vmem:[#allocation43_spill] sm:$0xff] %v3214_v63 }
 0x259   :  { %1394 = vrot.lane.b32.xlu1 %v1334_v4, %s2479_s7  ;;  %v682_v4 = vmul.f32 %v2987_v51, %v2967_v46 }
 0x25a   :  { %1370 = vrot.lane.b32.xlu0 %v1322_v43, %s2479_s7  ;;  %v1483_v43 = vsel %vm1482_vm8, %v3168_v10, %v1481_v20  ;;  %v3193_v13 = vpop.permute.xlu1 %1529 }
 0x25b   :  { %v1491_v15 = vmul.f32 %v1483_v43, %v2637_v2 }
 0x25d   :  { %727 = vrot.lane.b32.xlu1 %v671_v0, %s2472_s29  ;;  %v1489_v0 = vmul.f32 %v1481_v20, %v2614_v42  ;;  %v1965_v20 = vld [vmem:[#allocation2 + $0x10] sm:$0xff]  ;;  %v3221_v11 = vrot.slane %v1491_v15, %v2529_v3  ;;  %v1556_v15 = vmul.f32 %v3145_v48, %v3214_v63 }
 0x25e   :  { %725 = vrot.lane.b32.xlu0 %v670_v6, %s2472_s29  ;;  %v1488_v6 = vmul.f32 %v1483_v43, %v2617_v44 }
 0x25f   :  { %v3201_v33 = vrot.slane %v1489_v0, %v2529_v3  ;;  %v1968_v0 = vld [vmem:[#allocation2 + $0x28] sm:$0xff]  ;;  %4162 = vst [vmem:[#allocation44_spill] sm:$0xff] %v3221_v11  ;;  %v1555_v60 = vmul.f32 %v3145_v48, %v3221_v11 }
 0x260   :  { %v3207_v55 = vrot.slane %v1488_v6, %v2529_v3 }
 0x261   :  { %751 = vrot.lane.b32.xlu1 %v683_v45, %s2472_s29  ;;  %v1964_v45 = vld [vmem:[#allocation2 + $0x8] sm:$0xff]  ;;  %4159 = vst [vmem:[#allocation41_spill] sm:$0xff] %v3201_v33  ;;  %v1544_v43 = vmul.f32 %v3145_v48, %v3201_v33 }
 0x262   :  { %749 = vrot.lane.b32.xlu0 %v682_v4, %s2472_s29  ;;  %v1966_v4 = vld [vmem:[#allocation2 + $0x18] sm:$0xff]  ;;  %4160 = vst [vmem:[#allocation42_spill] sm:$0xff] %v3207_v55 }
 0x263   :  { %v2294_v56 = vpack.c.bf16 %v1966_v4, %v1964_v45  ;;  %v3216_v45 = vpop.permute.xlu1 %1700  ;;  %v1970_v4 = vld [vmem:[#allocation2 + $0x38] sm:$0xff] }
 0x264   :  { %v2298_v14 = vpack.c.bf16 %v1970_v4, %v1968_v0 }
 0x265   :  { %1160 = vrot.lane.b32.xlu1 %v1107_v34, %s2478_s6  ;;  %v1118_v34 = vmul.f32 %v3068_v16, %v3073_v26  ;;  %2295 = vmatprep.subr.bf16.mxu0 %v2294_v56 }
 0x266   :  { %1158 = vrot.lane.b32.xlu0 %v1106_v37, %s2478_s6  ;;  %v1963_v37 = vld [vmem:[#allocation2] sm:$0xff]  ;;  %2358 = vmatprep.subr.bf16.mxu1 %v2294_v56  ;;  %v1969_v56 = vld [vmem:[#allocation2 + $0x30] sm:$0xff] }
 0x267   :  { %v2296_v6 = vpack.c.bf16 %v1965_v20, %v1963_v37  ;;  %v1972_v37 = vld [vmem:[#allocation2 + $0x48] sm:$0xff]  ;;  %v2300_v20 = vpack.c.bf16 %v1969_v56, %v1967_v25  ;;  %v3233_v4 = vpop.permute.xlu1 %1314  ;;  %v1978_v56 = vld [vmem:[#allocation2 + $0x78] sm:$0xff] }
 0x268   :  { %v2302_v0 = vpack.c.bf16 %v1974_v59, %v1972_v37  ;;  %v1976_v25 = vld [vmem:[#allocation2 + $0x68] sm:$0xff]  ;;  %v681_v59 = vmul.f32 %v2987_v51, %v2978_v18  ;;  %v1487_v37 = vmul.f32 %v3168_v10, %v2610_v39 }
 0x269   :  { %1184 = vrot.lane.b32.xlu1 %v1119_v40, %s2478_s6  ;;  %v3223_v40 = vpop.permute.xlu0 %1698  ;;  %2297 = vmatpush1.bf16.msra.mxu0 %v2296_v6 }
 0x26a   :  { %1182 = vrot.lane.b32.xlu0 %v1118_v34, %s2478_s6  ;;  %v1543_v34 = vmul.f32 %v3145_v48, %v3207_v55  ;;  %2299 = vmatprep.subr.bf16.mxu0 %v2298_v14 }
 0x26b   :  { %2374 = vmatpush1.bf16.msra.mxu1 %v2296_v6  ;;  %v1490_v6 = vmul.f32 %v3168_v10, %v2632_v61  ;;  %v1117_v10 = vmul.f32 %v3068_v16, %v3092_v27 }
 0x26c   :  { %2359 = vmatprep.subr.bf16.mxu1 %v2298_v14 }
 0x26d   :  { %1594 = vrot.lane.b32.xlu1 %v1544_v43, %s2480_s10  ;;  %2301 = vmatpush1.bf16.msra.mxu0 %v2300_v20  ;;  %v3236_v43 = vpop.permute.xlu0 %879 }
 0x26e   :  { %1592 = vrot.lane.b32.xlu0 %v1543_v34, %s2480_s10  ;;  %2303 = vmatprep.subr.bf16.mxu0 %v2302_v0  ;;  %v1971_v34 = vld [vmem:[#allocation2 + $0x40] sm:$0xff] }
 0x26f   :  { %v2304_v14 = vpack.c.bf16 %v1973_v36, %v1971_v34  ;;  %2375 = vmatpush1.bf16.msra.mxu1 %v2300_v20  ;;  %v3250_v36 = vrot.slane %v1490_v6, %v2529_v3  ;;  %v3252_v20 = vpop.permute.xlu1 %1099  ;;  %v3257_v34 = vrot.slane %v1487_v37, %v2529_v3  ;;  %v1979_v6 = vld [vmem:[#allocation2 + $0x80] sm:$0xff] }
 0x270   :  { %2360 = vmatprep.subr.bf16.mxu1 %v2302_v0  ;;  %v1982_v0 = vld [vmem:[#allocation2 + $0x98] sm:$0xff] }
 0x271   :  { %1618 = vrot.lane.b32.xlu1 %v1556_v15, %s2480_s10  ;;  %v669_v15 = vmul.f32 %v2987_v51, %v2850_v52  ;;  %2305 = vmatpush1.bf16.msra.mxu0 %v2304_v14  ;;  %4163 = vst [vmem:[#allocation45_spill] sm:$0xff] %v3250_v36  ;;  %v2308_v51 = vpack.c.bf16 %v1977_v29, %v1975_v41  ;;  %4164 = vst [vmem:[#allocation46_spill] sm:$0xff] %v3257_v34  ;;  %v1981_v29 = vld [vmem:[#allocation2 + $0x90] sm:$0xff]  ;;  %v1984_v41 = vld [vmem:[#allocation2 + $0xa8] sm:$0xff] }
 0x272   :  { %1616 = vrot.lane.b32.xlu0 %v1555_v60, %s2480_s10  ;;  %v2306_v60 = vpack.c.bf16 %v1978_v56, %v1976_v25  ;;  %v3259_v25 = vpop.permute.xlu0 %1749  ;;  %v2310_v56 = vpack.c.bf16 %v1982_v0, %v1980_v30  ;;  %v2312_v37 = vpack.c.bf16 %v1981_v29, %v1979_v6  ;;  %v1983_v0 = vld [vmem:[#allocation2 + $0xa0] sm:$0xff]  ;;  %v1988_v6 = vld [vmem:[#allocation2 + $0xc8] sm:$0xff] }
 0x273   :  { %2376 = vmatpush1.bf16.msra.mxu1 %v2304_v14  ;;  %v1554_v14 = vmul.f32 %v3145_v48, %v3250_v36 }
 0x274   :  { %2307 = vmatprep.subr.bf16.mxu0 %v2306_v60  ;;  %2361 = vmatprep.subr.bf16.mxu1 %v2306_v60  ;;  %v3269_v60 = vpop.permute.xlu1 %1319 }
 0x275   :  { %747 = vrot.lane.b32.xlu1 %v681_v59, %s2472_s29  ;;  %v1105_v59 = vmul.f32 %v3068_v16, %v3080_v17  ;;  %2309 = vmatpush1.bf16.msra.mxu0 %v2308_v51  ;;  %v1542_v16 = vmul.f32 %v3145_v48, %v3257_v34  ;;  %4165 = vst [vmem:[#allocation47_spill] sm:$0xff] %v3269_v60  ;;  %v1990_v48 = vld [vmem:[#allocation2 + $0xd8] sm:$0xff] }
 0x276   :  { %723 = vrot.lane.b32.xlu0 %v669_v15, %s2472_s29  ;;  %2311 = vmatprep.subr.bf16.mxu0 %v2310_v56  ;;  %v1986_v15 = vld [vmem:[#allocation2 + $0xb8] sm:$0xff] }
 0x277   :  { %2377 = vmatpush1.bf16.msra.mxu1 %v2308_v51  ;;  %v2314_v30 = vpack.c.bf16 %v1986_v15, %v1984_v41  ;;  %v890_v51 = vmul.f32 %v3151_v62, %v3005_v57  ;;  %v2318_v41 = vpack.c.bf16 %v1990_v48, %v1988_v6  ;;  %v1989_v15 = vld [vmem:[#allocation2 + $0xd0] sm:$0xff]  ;;  %v1703_v48 = vsel %vm1702_vm9, %v3223_v40, %v3216_v45 }
 0x278   :  { %2362 = vmatprep.subr.bf16.mxu1 %v2310_v56  ;;  %v889_v56 = vmul.f32 %v3151_v62, %v3008_v24  ;;  %v3281_v60 = vpop.permute.xlu1 %1539 }
 0x279   :  { %1180 = vrot.lane.b32.xlu1 %v1117_v10, %s2478_s6  ;;  %2313 = vmatpush1.bf16.msra.mxu0 %v2312_v37  ;;  %v3272_v10 = vpop.permute.xlu0 %1534  ;;  %4167 = vst [vmem:[#allocation49_spill] sm:$0xff] %v3281_v60  ;;  %v1327_v60 = vmul.f32 %v3164_v12, %v3123_v38 }
 0x27a   :  { %1156 = vrot.lane.b32.xlu0 %v1105_v59, %s2478_s6  ;;  %4166 = vst [vmem:[#allocation48_spill] sm:$0xff] %v3272_v10  ;;  %2315 = vmatprep.subr.bf16.mxu0 %v2314_v30  ;;  %v1985_v59 = vld [vmem:[#allocation2 + $0xb0] sm:$0xff] }
 0x27b   :  { %v2316_v29 = vpack.c.bf16 %v1985_v59, %v1983_v0  ;;  %2378 = vmatpush1.bf16.msra.mxu1 %v2312_v37  ;;  %v902_v37 = vmul.f32 %v3151_v62, %v3011_v31  ;;  %v1994_v59 = vld [vmem:[#allocation2 + $0xf8] sm:$0xff] }
 0x27c   :  { %2363 = vmatprep.subr.bf16.mxu1 %v2314_v30  ;;  %v901_v30 = vmul.f32 %v3151_v62, %v3015_v32 }
 0x27d   :  { %1614 = vrot.lane.b32.xlu1 %v1554_v14, %s2480_s10  ;;  %2317 = vmatpush1.bf16.msra.mxu0 %v2316_v29  ;;  %v1987_v14 = vld [vmem:[#allocation2 + $0xc0] sm:$0xff]  ;;  %v3285_v6 = vpop.permute.xlu0 %1754 }
 0x27e   :  { %1590 = vrot.lane.b32.xlu0 %v1542_v16, %s2480_s10  ;;  %2319 = vmatprep.subr.bf16.mxu0 %v2318_v41  ;;  %v1992_v16 = vld [vmem:[#allocation2 + $0xe8] sm:$0xff]  ;;  %v2320_v0 = vpack.c.bf16 %v1989_v15, %v1987_v14  ;;  %4168 = vst [vmem:[#allocation50_spill] sm:$0xff] %v3285_v6  ;;  %v1993_v14 = vld [vmem:[#allocation2 + $0xf0] sm:$0xff]  ;;  %v1709_v15 = vmul.f32 %v3216_v45, %v2614_v42  ;;  %v1995_v42 = vld [vmem:[#allocation2 + $0x100] sm:$0xff] }
 0x27f   :  { %2379 = vmatpush1.bf16.msra.mxu1 %v2316_v29  ;;  %v1996_v29 = vld [vmem:[#allocation2 + $0x108] sm:$0xff] }
 0x280   :  { %2364 = vmatprep.subr.bf16.mxu1 %v2318_v41  ;;  %v1998_v41 = vld [vmem:[#allocation2 + $0x118] sm:$0xff] }
 0x281   :  { %946 = vrot.lane.b32.xlu1 %v890_v51, %s2477_s1  ;;  %v2322_v51 = vpack.c.bf16 %v1994_v59, %v1992_v16  ;;  %2321 = vmatpush1.bf16.msra.mxu0 %v2320_v0  ;;  %v1708_v59 = vmul.f32 %v1703_v48, %v2617_v44  ;;  %v2326_v6 = vpack.c.bf16 %v1998_v41, %v1996_v29  ;;  %v3303_v10 = vpop.permute.xlu0 %1759 }
 0x282   :  { %944 = vrot.lane.b32.xlu0 %v889_v56, %s2477_s1  ;;  %v1991_v56 = vld [vmem:[#allocation2 + $0xe0] sm:$0xff]  ;;  %4170 = vst [vmem:[#allocation52_spill] sm:$0xff] %v3303_v10  ;;  %v1712_v44 = vmul.f32 %v3216_v45, %v2641_v5  ;;  %v1711_v41 = vmul.f32 %v1703_v48, %v2637_v2  ;;  %v1338_v10 = vmul.f32 %v3164_v12, %v3117_v23  ;;  %v2001_v45 = vld [vmem:[#allocation2 + $0x130] sm:$0xff] }
 0x283   :  { %2323 = vmatprep.subr.bf16.mxu0 %v2322_v51  ;;  %v2324_v16 = vpack.c.bf16 %v1993_v14, %v1991_v56  ;;  %2380 = vmatpush1.bf16.msra.mxu1 %v2320_v0  ;;  %v1997_v0 = vld [vmem:[#allocation2 + $0x110] sm:$0xff]  ;;  %v2000_v56 = vld [vmem:[#allocation2 + $0x128] sm:$0xff]  ;;  %v3309_v14 = vrot.slane %v1709_v15, %v2529_v3  ;;  %v1999_v5 = vld [vmem:[#allocation2 + $0x120] sm:$0xff] }
 0x284   :  { %2365 = vmatprep.subr.bf16.mxu1 %v2322_v51  ;;  %v1339_v51 = vmul.f32 %v3164_v12, %v3132_v22  ;;  %v2328_v29 = vpack.c.bf16 %v1997_v0, %v1995_v42  ;;  %v2004_v15 = vld [vmem:[#allocation2 + $0x148] sm:$0xff]  ;;  %v3329_v42 = vrot.slane %v1711_v41, %v2529_v3  ;;  %v2010_v41 = vld [vmem:[#allocation2 + $0x178] sm:$0xff] }
 0x285   :  { %970 = vrot.lane.b32.xlu1 %v902_v37, %s2477_s1  ;;  %v1326_v37 = vmul.f32 %v3164_v12, %v3107_v58  ;;  %2325 = vmatpush1.bf16.msra.mxu0 %v2324_v16  ;;  %v1764_v48 = vmul.f32 %v3178_v35, %v3309_v14  ;;  %v3331_v0 = vpop.permute.xlu0 %739 }
 0x286   :  { %968 = vrot.lane.b32.xlu0 %v901_v30, %s2477_s1  ;;  %v3300_v30 = vpop.permute.xlu1 %737  ;;  %2327 = vmatprep.subr.bf16.mxu0 %v2326_v6  ;;  %4172 = vst [vmem:[#allocation54_spill] sm:$0xff] %v3331_v0 }
 0x287   :  { %4169 = vst [vmem:[#allocation51_spill] sm:$0xff] %v3300_v30  ;;  %2381 = vmatpush1.bf16.msra.mxu1 %v2324_v16  ;;  %v3322_v16 = vrot.slane %v1712_v44, %v2529_v3  ;;  %v2003_v44 = vld [vmem:[#allocation2 + $0x140] sm:$0xff] }
 0x288   :  { %2366 = vmatprep.subr.bf16.mxu1 %v2326_v6  ;;  %v2006_v6 = vld [vmem:[#allocation2 + $0x158] sm:$0xff] }
 0x289   :  { %1380 = vrot.lane.b32.xlu1 %v1327_v60, %s2479_s7  ;;  %v2002_v60 = vld [vmem:[#allocation2 + $0x138] sm:$0xff]  ;;  %2329 = vmatpush1.bf16.msra.mxu0 %v2328_v29 }
 0x28a   :  { %1378 = vrot.lane.b32.xlu0 %v1326_v37, %s2479_s7  ;;  %v3315_v37 = vrot.slane %v1708_v59, %v2529_v3  ;;  %v2330_v30 = vpack.c.bf16 %v2002_v60, %v2000_v56  ;;  %v3324_v2 = vpop.permute.xlu1 %735  ;;  %v2332_v59 = vpack.c.bf16 %v2001_v45, %v1999_v5  ;;  %v2334_v56 = vpack.c.bf16 %v2006_v6, %v2004_v15  ;;  %v2008_v60 = vld [vmem:[#allocation2 + $0x168] sm:$0xff]  ;;  %v2007_v6 = vld [vmem:[#allocation2 + $0x160] sm:$0xff] }
 0x28b   :  { %4171 = vst [vmem:[#allocation53_spill] sm:$0xff] %v3324_v2  ;;  %2382 = vmatpush1.bf16.msra.mxu1 %v2328_v29  ;;  %v1776_v45 = vmul.f32 %v3178_v35, %v3322_v16  ;;  %v2338_v15 = vpack.c.bf16 %v2010_v41, %v2008_v60  ;;  %v2014_v2 = vld [vmem:[#allocation2 + $0x198] sm:$0xff]  ;;  %v888_v41 = vmul.f32 %v3151_v62, %v3033_v53 }
 0x28c   :  { %2331 = vmatprep.subr.bf16.mxu0 %v2330_v30  ;;  %2367 = vmatprep.subr.bf16.mxu1 %v2330_v30 }
 0x28d   :  { %1404 = vrot.lane.b32.xlu1 %v1339_v51, %s2479_s7  ;;  %2333 = vmatpush1.bf16.msra.mxu0 %v2332_v59  ;;  %v2005_v51 = vld [vmem:[#allocation2 + $0x150] sm:$0xff] }
 0x28e   :  { %1402 = vrot.lane.b32.xlu0 %v1338_v10, %s2479_s7  ;;  %v1763_v10 = vmul.f32 %v3178_v35, %v3315_v37  ;;  %2335 = vmatprep.subr.bf16.mxu0 %v2334_v56  ;;  %v2336_v29 = vpack.c.bf16 %v2005_v51, %v2003_v44  ;;  %v2012_v51 = vld [vmem:[#allocation2 + $0x188] sm:$0xff] }
 0x28f   :  { %2383 = vmatpush1.bf16.msra.mxu1 %v2332_v59  ;;  %v1707_v59 = vmul.f32 %v3223_v40, %v2610_v39  ;;  %v2011_v39 = vld [vmem:[#allocation2 + $0x180] sm:$0xff] }
 0x290   :  { %2368 = vmatprep.subr.bf16.mxu1 %v2334_v56  ;;  %v1908_v56 = vld [vmem:[%s4093_s2 + $0x8] sm:$0xff] }
 0x291   :  { %1814 = vrot.lane.b32.xlu1 %v1764_v48, %s2481_s4  ;;  %v1775_v48 = vmul.f32 %v3178_v35, %v3329_v42  ;;  %2337 = vmatpush1.bf16.msra.mxu0 %v2336_v29 }
 0x292   :  { %1812 = vrot.lane.b32.xlu0 %v1763_v10, %s2481_s4  ;;  %v2009_v10 = vld [vmem:[#allocation2 + $0x170] sm:$0xff]  ;;  %2339 = vmatprep.subr.bf16.mxu0 %v2338_v15 }
 0x293   :  { %v3337_v5 = vpop.permute.xlu1 %934  ;;  %v2340_v44 = vpack.c.bf16 %v2009_v10, %v2007_v6  ;;  %2384 = vmatpush1.bf16.msra.mxu1 %v2336_v29  ;;  %v3360_v6 = vrot.slane %v1707_v59, %v2529_v3  ;;  %v2015_v59 = vld [vmem:[#allocation2 + $0x1a0] sm:$0xff] }
 0x294   :  { %v3341_v30 = vpop.permute.xlu0 %932  ;;  %2369 = vmatprep.subr.bf16.mxu1 %v2338_v15  ;;  %v1710_v15 = vmul.f32 %v3223_v40, %v2632_v61 }
 0x295   :  { %1838 = vrot.lane.b32.xlu1 %v1776_v45, %s2481_s4  ;;  %v2342_v45 = vpack.c.bf16 %v2014_v2, %v2012_v51  ;;  %2341 = vmatpush1.bf16.msra.mxu0 %v2340_v44  ;;  %v2016_v2 = vld [vmem:[#allocation2 + $0x1a8] sm:$0xff]  ;;  %v2018_v51 = vld [vmem:[#allocation2 + $0x1b8] sm:$0xff]  ;;  %v1762_v61 = vmul.f32 %v3178_v35, %v3360_v6 }
 0x296   :  { %1836 = vrot.lane.b32.xlu0 %v1775_v48, %s2481_s4  ;;  %v2013_v48 = vld [vmem:[#allocation2 + $0x190] sm:$0xff] }
 0x297   :  { %v3349_v60 = vpop.permute.xlu1 %958  ;;  %2343 = vmatprep.subr.bf16.mxu0 %v2342_v45  ;;  %v2344_v29 = vpack.c.bf16 %v2013_v48, %v2011_v39  ;;  %2385 = vmatpush1.bf16.msra.mxu1 %v2340_v44  ;;  %v2017_v44 = vld [vmem:[#allocation2 + $0x1b0] sm:$0xff]  ;;  %v2020_v48 = vld [vmem:[#allocation2 + $0x1c8] sm:$0xff] }
 0x298   :  { %4173 = vst [vmem:[#allocation55_spill] sm:$0xff] %v3349_v60  ;;  %v3356_v0 = vpop.permute.xlu0 %956  ;;  %v1325_v60 = vmul.f32 %v3164_v12, %v3156_v7  ;;  %2370 = vmatprep.subr.bf16.mxu1 %v2342_v45  ;;  %v2348_v40 = vpack.c.bf16 %v2017_v44, %v2015_v59  ;;  %v2024_v59 = vld [vmem:[#allocation2 + $0x1e8] sm:$0xff]  ;;  %v2026_v44 = vld [vmem:[#allocation2 + $0x1f8] sm:$0xff] }
 0x299   :  { %4174 = vst [vmem:[#allocation56_spill] sm:$0xff] %v3356_v0  ;;  %942 = vrot.lane.b32.xlu1 %v888_v41, %s2477_s1  ;;  %v2346_v0 = vpack.c.bf16 %v2018_v51, %v2016_v2  ;;  %2345 = vmatpush1.bf16.msra.mxu0 %v2344_v29  ;;  %v2019_v51 = vld [vmem:[#allocation2 + $0x1c0] sm:$0xff] }
 0x29a   :  { %1918 = vperm.xlu0 %2413, %v1908_v56   ;;  %v900_v56 = vmul.f32 %v3151_v62, %v3029_v21  ;;  %v3379_v62 = vrot.slane %v1710_v15, %v2529_v3  ;;  %v673_v3 = vmul.f32 %v2989_v54, %v2855_v28  ;;  %v685_v28 = vmul.f32 %v2989_v54, %v2967_v46 }
 0x29b   :  { %v3362_v10 = vpop.permute.xlu1 %954  ;;  %2347 = vmatprep.subr.bf16.mxu0 %v2346_v0  ;;  %2386 = vmatpush1.bf16.msra.mxu1 %v2344_v29  ;;  %v2021_v29 = vld [vmem:[#allocation2 + $0x1d0] sm:$0xff]  ;;  %v686_v46 = vmul.f32 %v2989_v54, %v2975_v49  ;;  %v1546_v49 = vmul.f32 %v3193_v13, %v3207_v55 }
 0x29c   :  { %4175 = vst [vmem:[#allocation57_spill] sm:$0xff] %v3362_v10  ;;  %v3368_v41 = vpop.permute.xlu0 %930  ;;  %v2022_v10 = vld [vmem:[#allocation2 + $0x1d8] sm:$0xff]  ;;  %4177 = vst [vmem:[#allocation59_spill] sm:$0xff] %v3379_v62  ;;  %2371 = vmatprep.subr.bf16.mxu1 %v2346_v0  ;;  %v2352_v15 = vpack.c.bf16 %v2021_v29, %v2019_v51  ;;  %v1774_v0 = vmul.f32 %v3178_v35, %v3379_v62  ;;  %v674_v35 = vmul.f32 %v2989_v54, %v2864_v50 }
 0x29d   :  { %1376 = vrot.lane.b32.xlu1 %v1325_v60, %s2479_s7  ;;  %v1337_v60 = vmul.f32 %v3164_v12, %v3149_v19  ;;  %v2350_v2 = vpack.c.bf16 %v2022_v10, %v2020_v48  ;;  %2349 = vmatpush1.bf16.msra.mxu0 %v2348_v40  ;;  %v2354_v10 = vpack.c.bf16 %v2026_v44, %v2024_v59  ;;  %v2025_v48 = vld [vmem:[#allocation2 + $0x1f0] sm:$0xff] }
 0x29e   :  { %966 = vrot.lane.b32.xlu0 %v900_v56, %s2477_s1  ;;  %v1121_v50 = vmul.f32 %v3196_v8, %v3073_v26  ;;  %v1110_v59 = vmul.f32 %v3196_v8, %v3050_v47 }
 0x29f   :  { %v3374_v39 = vpop.permute.xlu1 %721  ;;  %2351 = vmatprep.subr.bf16.mxu0 %v2350_v2  ;;  %2387 = vmatpush1.bf16.msra.mxu1 %v2348_v40 }
 0x2a0   :  { %4176 = vst [vmem:[#allocation58_spill] sm:$0xff] %v3374_v39  ;;  %v3381_v45 = vpop.permute.xlu0 %719  ;;  %2372 = vmatprep.subr.bf16.mxu1 %v2350_v2  ;;  %v1109_v2 = vmul.f32 %v3196_v8, %v3056_v1  ;;  %v1779_v39 = vmul.f32 %v3259_v25, %v3322_v16 }
 0x2a1   :  { %1810 = vrot.lane.b32.xlu1 %v1762_v61, %s2481_s4  ;;  %v2023_v61 = vld [vmem:[#allocation2 + $0x1e0] sm:$0xff]  ;;  %2353 = vmatpush1.bf16.msra.mxu0 %v2352_v15 }
 0x2a2   :  { %1400 = vrot.lane.b32.xlu0 %v1337_v60, %s2479_s7  ;;  %v2356_v60 = vpack.c.bf16 %v2025_v48, %v2023_v61  ;;  %2355 = vmatprep.subr.bf16.mxu0 %v2354_v10  ;;  %v1558_v61 = vmul.f32 %v3193_v13, %v3221_v11 }
 0x2a3   :  { %v3387_v56 = vpop.permute.xlu1 %745  ;;  %2388 = vmatpush1.bf16.msra.mxu1 %v2352_v15 }
 0x2a4   :  { %4178 = vst [vmem:[#allocation60_spill] sm:$0xff] %v3387_v56  ;;  %v3391_v12 = vpop.permute.xlu0 %743  ;;  %2373 = vmatprep.subr.bf16.mxu1 %v2354_v10  ;;  %v1122_v10 = vmul.f32 %v3196_v8, %v3064_v9  ;;  %v1767_v56 = vmul.f32 %v3259_v25, %v3309_v14 }
 0x2a5   :  { %731 = vrot.lane.b32.xlu1 %v673_v3, %s2472_s29  ;;  %2357 = vmatpush1.bf16.msra.mxu0 %v2356_v60 }
 0x2a6   :  { %1834 = vrot.lane.b32.xlu0 %v1774_v0, %s2481_s4 }
 0x2a7   :  { %v3399_v40 = vpop.permute.xlu1 %1154  ;;  %2389 = vmatpush1.bf16.msra.mxu1 %v2356_v60  ;;  %v1547_v60 = vmul.f32 %v3193_v13, %v3201_v33 }
 0x2a8   :  { %v3401_v51 = vpop.permute.xlu0 %1152 }
 0x2a9   :  { %755 = vrot.lane.b32.xlu1 %v685_v28, %s2472_s29 }
 0x2aa   :  { %733 = vrot.lane.b32.xlu0 %v674_v35, %s2472_s29  ;;  %v672_v35 = vmul.f32 %v2989_v54, %v2850_v52  ;;  %v1545_v52 = vmul.f32 %v3193_v13, %v3257_v34 }
 0x2ab   :  { %v3414_v3 = vpop.permute.xlu1 %1178 }
 0x2ac   :  { %v3409_v29 = vpop.permute.xlu0 %1176 }
 0x2ad   :  { %1164 = vrot.lane.b32.xlu1 %v1109_v2, %s2478_s6 }
 0x2ae   :  { %757 = vrot.lane.b32.xlu0 %v686_v46, %s2472_s29  ;;  %v1559_v46 = vmul.f32 %v3193_v13, %v3214_v63 }
 0x2af   :  { %v3427_v44 = vpop.permute.xlu1 %1150 }
 0x2b0   :  { %v3419_v15 = vpop.permute.xlu0 %741 }
 0x2b1   :  { %1188 = vrot.lane.b32.xlu1 %v1121_v50, %s2478_s6  ;;  %v1108_v50 = vmul.f32 %v3196_v8, %v3080_v17 }
 0x2b2   :  { %1166 = vrot.lane.b32.xlu0 %v1110_v59, %s2478_s6 }
 0x2b3   :  { %v3442_v28 = vpop.permute.xlu1 %938 }
 0x2b4   :  { %v3429_v0 = vpop.permute.xlu0 %1174 }
 0x2b5   :  { %4179 = vst [vmem:[#allocation61_spill] sm:$0xff] %v3429_v0  ;;  %1598 = vrot.lane.b32.xlu1 %v1546_v49, %s2480_s10 }
 0x2b6   :  { %1190 = vrot.lane.b32.xlu0 %v1122_v10, %s2478_s6  ;;  %v684_v10 = vmul.f32 %v2989_v54, %v2978_v18  ;;  %v892_v18 = vmul.f32 %v3236_v43, %v3008_v24 }
 0x2b7   :  { %v3455_v59 = vpop.permute.xlu1 %962 }
 0x2b8   :  { %v3437_v48 = vpop.permute.xlu0 %940 }
 0x2b9   :  { %4180 = vst [vmem:[#allocation62_spill] sm:$0xff] %v3437_v48  ;;  %1622 = vrot.lane.b32.xlu1 %v1558_v61, %s2480_s10 }
 0x2ba   :  { %1600 = vrot.lane.b32.xlu0 %v1547_v60, %s2480_s10  ;;  %v1120_v60 = vmul.f32 %v3196_v8, %v3092_v27  ;;  %v904_v8 = vmul.f32 %v3236_v43, %v3015_v32  ;;  %v905_v32 = vmul.f32 %v3236_v43, %v3011_v31  ;;  %v1766_v31 = vmul.f32 %v3259_v25, %v3315_v37 }
 0x2bc   :  { %v3447_v2 = vpop.permute.xlu0 %964 }
 0x2bd   :  { %4181 = vst [vmem:[#allocation63_spill] sm:$0xff] %v3447_v2  ;;  %729 = vrot.lane.b32.xlu1 %v672_v35, %s2472_s29  ;;  %v3470_v35 = vpop.permute.xlu1 %1372  ;;  %v1778_v2 = vmul.f32 %v3259_v25, %v3329_v42 }
 0x2be   :  { %1624 = vrot.lane.b32.xlu0 %v1559_v46, %s2480_s10  ;;  %v1557_v46 = vmul.f32 %v3193_v13, %v3250_v36  ;;  %v1329_v13 = vmul.f32 %v3233_v4, %v3107_v58 }
 0x2c0   :  { %v3457_v49 = vpop.permute.xlu0 %1374 }
 0x2c1   :  { %1162 = vrot.lane.b32.xlu1 %v1108_v50, %s2478_s6  ;;  %v3483_v50 = vpop.permute.xlu1 %1396 }
 0x2c2   :  { %753 = vrot.lane.b32.xlu0 %v684_v10, %s2472_s29 }
 0x2c4   :  { %v3465_v61 = vpop.permute.xlu0 %1398 }
 0x2c5   :  { %1596 = vrot.lane.b32.xlu1 %v1545_v52, %s2480_s10  ;;  %v893_v52 = vmul.f32 %v3236_v43, %v3005_v57  ;;  %v1341_v57 = vmul.f32 %v3233_v4, %v3117_v23 }
 0x2c6   :  { %1186 = vrot.lane.b32.xlu0 %v1120_v60, %s2478_s6 }
 0x2c8   :  { %v3475_v54 = vpop.permute.xlu0 %936 }
 0x2c9   :  { %950 = vrot.lane.b32.xlu1 %v892_v18, %s2477_s1 }
 0x2ca   :  { %1620 = vrot.lane.b32.xlu0 %v1557_v46, %s2480_s10 }
 0x2cc   :  { %v3485_v10 = vpop.permute.xlu0 %1370 }
 0x2cd   :  { %974 = vrot.lane.b32.xlu1 %v904_v8, %s2477_s1  ;;  %v1330_v8 = vmul.f32 %v3233_v4, %v3123_v38 }
 0x2ce   :  { %952 = vrot.lane.b32.xlu0 %v893_v52, %s2477_s1 }
 0x2d0   :  { %v3493_v24 = vpop.permute.xlu1 %1913  ;;  %v3495_v60 = vpop.permute.xlu0 %725 }
 0x2d1   :  { %1384 = vrot.lane.b32.xlu1 %v1329_v13, %s2479_s7 }
 0x2d2   :  { %976 = vrot.lane.b32.xlu0 %v905_v32, %s2477_s1  ;;  %v1342_v32 = vmul.f32 %v3233_v4, %v3132_v22 }
 0x2d4   :  { %v3503_v18 = vpop.permute.xlu1 %960  ;;  %v3505_v46 = vpop.permute.xlu0 %749 }
 0x2d5   :  { %4182 = vst [vmem:[#allocation64_spill] sm:$0xff] %v3503_v18  ;;  %1408 = vrot.lane.b32.xlu1 %v1341_v57, %s2479_s7 }
 0x2d6   :  { %1386 = vrot.lane.b32.xlu0 %v1330_v8, %s2479_s7 }
 0x2d8   :  { %v3513_v52 = vpop.permute.xlu1 %1394  ;;  %v3515_v13 = vpop.permute.xlu0 %1158 }
 0x2d9   :  { %4183 = vst [vmem:[#allocation65_spill] sm:$0xff] %v3513_v52  ;;  %1818 = vrot.lane.b32.xlu1 %v1766_v31, %s2481_s4  ;;  %v1909_v31 = vld [vmem:[%s4093_s2 + $0x10] sm:$0xff]  ;;  %v891_v52 = vmul.f32 %v3236_v43, %v3033_v53  ;;  %v1777_v53 = vmul.f32 %v3259_v25, %v3379_v62 }
 0x2da   :  { %1410 = vrot.lane.b32.xlu0 %v1342_v32, %s2479_s7  ;;  %v4196_v62 = vld [vmem:[#allocation10_spill] sm:$0xff] }
 0x2dc   :  { %v3523_v57 = vpop.permute.xlu1 %727  ;;  %v3525_v8 = vpop.permute.xlu0 %1182 }
 0x2dd   :  { %4184 = vst [vmem:[#allocation66_spill] sm:$0xff] %v3523_v57  ;;  %4185 = vst [vmem:[#allocation67_spill] sm:$0xff] %v3525_v8  ;;  %1842 = vrot.lane.b32.xlu1 %v1778_v2, %s2481_s4  ;;  %v903_v57 = vmul.f32 %v3236_v43, %v3029_v21  ;;  %v1328_v21 = vmul.f32 %v3233_v4, %v3156_v7 }
 0x2de   :  { %1820 = vrot.lane.b32.xlu0 %v1767_v56, %s2481_s4 }
 0x2e0   :  { %v3534_v48 = vpop.permute.xlu1 %751  ;;  %v3536_v32 = vpop.permute.xlu0 %1592 }
 0x2e1   :  { %4186 = vst [vmem:[#allocation68_spill] sm:$0xff] %v3534_v48  ;;  %1923 = vperm.xlu1 %2414, %v1909_v31   ;;  %v1340_v48 = vmul.f32 %v3233_v4, %v3149_v19  ;;  %v1113_v4 = vmul.f32 %v3252_v20, %v3050_v47 }
 0x2e2   :  { %1844 = vrot.lane.b32.xlu0 %v1779_v39, %s2481_s4 }
 0x2e4   :  { %v3543_v2 = vpop.permute.xlu1 %1160  ;;  %v3545_v56 = vpop.permute.xlu0 %1616 }
 0x2e5   :  { %4187 = vst [vmem:[#allocation69_spill] sm:$0xff] %v3543_v2  ;;  %972 = vrot.lane.b32.xlu1 %v903_v57, %s2477_s1  ;;  %v1765_v57 = vmul.f32 %v3259_v25, %v3360_v6  ;;  %v1125_v25 = vmul.f32 %v3252_v20, %v3064_v9 }
 0x2e6   :  { %948 = vrot.lane.b32.xlu0 %v891_v52, %s2477_s1 }
 0x2e8   :  { %v3553_v31 = vpop.permute.xlu1 %1184  ;;  %v3555_v39 = vpop.permute.xlu0 %723 }
 0x2e9   :  { %4188 = vst [vmem:[#allocation70_spill] sm:$0xff] %v3553_v31  ;;  %1406 = vrot.lane.b32.xlu1 %v1340_v48, %s2479_s7  ;;  %v1112_v31 = vmul.f32 %v3252_v20, %v3056_v1  ;;  %v4190_v1 = vld [vmem:[#allocation48_spill] sm:$0xff] }
 0x2ea   :  { %1382 = vrot.lane.b32.xlu0 %v1328_v21, %s2479_s7  ;;  %v1550_v2 = vmul.f32 %v4190_v1, %v3201_v33  ;;  %v1562_v9 = vmul.f32 %v4190_v1, %v3214_v63  ;;  %v1123_v33 = vmul.f32 %v3252_v20, %v3092_v27  ;;  %v4195_v63 = vld [vmem:[#allocation11_spill] sm:$0xff]  ;;  %v4201_v27 = vld [vmem:[#allocation20_spill] sm:$0xff] }
 0x2ec   :  { %v3563_v43 = vpop.permute.xlu1 %1594  ;;  %v3565_v52 = vpop.permute.xlu0 %1156 }
 0x2ed   :  { %1840 = vrot.lane.b32.xlu1 %v1777_v53, %s2481_s4 }
 0x2ee   :  { %1816 = vrot.lane.b32.xlu0 %v1765_v57, %s2481_s4  ;;  %v1124_v57 = vmul.f32 %v3252_v20, %v3073_v26 }
 0x2f0   :  { %v3573_v48 = vpop.permute.xlu1 %1618  ;;  %v3575_v21 = vpop.permute.xlu0 %1590 }
 0x2f1   :  { %4189 = vst [vmem:[#allocation71_spill] sm:$0xff] %v3575_v21  ;;  %1172 = vrot.lane.b32.xlu1 %v1113_v4, %s2478_s6 }
 0x2f2   :  { %1170 = vrot.lane.b32.xlu0 %v1112_v31, %s2478_s6  ;;  %v1549_v31 = vmul.f32 %v4190_v1, %v3207_v55  ;;  %v321_v55 = vsel %vm319_vm3, %v4196_v62, %v4195_v63 }
 0x2f4   :  { %v3583_v53 = vpop.permute.xlu1 %747  ;;  %v3588_v47 = vpop.permute.xlu0 %944 }
 0x2f5   :  { %1196 = vrot.lane.b32.xlu1 %v1125_v25, %s2478_s6 }
 0x2f6   :  { %1194 = vrot.lane.b32.xlu0 %v1124_v57, %s2478_s6  ;;  %v1561_v57 = vmul.f32 %v4190_v1, %v3221_v11  ;;  %v4198_v11 = vld [vmem:[#allocation8_spill] sm:$0xff] }
 0x2f8   :  { %v3593_v4 = vpop.permute.xlu1 %1180  ;;  %v3601_v26 = vpop.permute.xlu0 %968 }
 0x2f9   :  { %4191 = vst [vmem:[#allocation48_spill] sm:$0xff] %v3593_v4  ;;  %1606 = vrot.lane.b32.xlu1 %v1550_v2, %s2480_s10  ;;  %4192 = vst [vmem:[#allocation72_spill] sm:$0xff] %v3601_v26  ;;  %v4204_v4 = vld [vmem:[#allocation15_spill] sm:$0xff] }
 0x2fa   :  { %1604 = vrot.lane.b32.xlu0 %v1549_v31, %s2480_s10  ;;  %v1111_v31 = vmul.f32 %v3252_v20, %v3080_v17  ;;  %v1560_v17 = vmul.f32 %v4190_v1, %v3250_v36  ;;  %v4209_v36 = vld [vmem:[#allocation29_spill] sm:$0xff] }
 0x2fc   :  { %v3603_v25 = vpop.permute.xlu1 %1614 }
 0x2fd   :  { %4193 = vst [vmem:[#allocation73_spill] sm:$0xff] %v3603_v25  ;;  %1630 = vrot.lane.b32.xlu1 %v1562_v9, %s2480_s10  ;;  %v4197_v25 = vld [vmem:[#allocation13_spill] sm:$0xff]  ;;  %v3621_v9 = vpop.permute.xlu0 %1378 }
 0x2fe   :  { %1628 = vrot.lane.b32.xlu0 %v1561_v57, %s2480_s10  ;;  %v133_v26 = vmul.f32 %v4198_v11, %v4197_v25  ;;  %4199 = vst [vmem:[#allocation11_spill] sm:$0xff] %v3621_v9  ;;  %v4200_v57 = vld [vmem:[#allocation21_spill] sm:$0xff]  ;;  %v4206_v9 = vld [vmem:[#allocation38_spill] sm:$0xff] }
 0x2ff   :  { %v4203_v25 = vld [vmem:[#allocation17_spill] sm:$0xff] }
 0x300   :  { %v3611_v2 = vpop.permute.xlu1 %946  ;;  %v353_v20 = vadd.f32 %v321_v55, %v133_v26  ;;  %v329_v8 = vsel %vm319_vm3, %v4204_v4, %v4203_v25  ;;  %v980_v25 = vsel %vm978_vm11, %v3341_v30, %v3337_v5  ;;  %v1200_v5 = vsel %vm1198_vm12, %v3401_v51, %v3399_v40 }
 0x301   :  { %4194 = vst [vmem:[#allocation74_spill] sm:$0xff] %v3611_v2  ;;  %1192 = vrot.lane.b32.xlu1 %v1123_v33, %s2478_s6  ;;  %v541_v2 = vsel %vm539_vm4, %v4201_v27, %v4200_v57  ;;  %v1548_v33 = vmul.f32 %v4190_v1, %v3257_v34  ;;  %v4207_v57 = vld [vmem:[#allocation18_spill] sm:$0xff]  ;;  %v4210_v34 = vld [vmem:[#allocation47_spill] sm:$0xff]  ;;  %v3651_v18 = vpop.permute.xlu0 %1402 }
 0x302   :  { %1168 = vrot.lane.b32.xlu0 %v1111_v31, %s2478_s6  ;;  %v4205_v31 = vld [vmem:[#allocation39_spill] sm:$0xff]  ;;  %v141_v55 = vmul.f32 %v4198_v11, %v4207_v57  ;;  %v573_v26 = vadd.f32 %v541_v2, %v353_v20  ;;  %4211 = vst [vmem:[#allocation13_spill] sm:$0xff] %v3651_v18  ;;  %v1332_v20 = vmul.f32 %v4210_v34, %v3107_v58 }
 0x303   :  { %v761_v21 = vsel %vm759_vm10, %v4206_v9, %v4205_v31  ;;  %v1333_v31 = vmul.f32 %v4210_v34, %v3123_v38  ;;  %v4214_v57 = vld [vmem:[#allocation51_spill] sm:$0xff]  ;;  %v1420_v58 = vsel %vm1418_vm13, %v3470_v35, %v3457_v49 }
 0x304   :  { %v3629_v63 = vpop.permute.xlu1 %970  ;;  %v361_v0 = vadd.f32 %v329_v8, %v141_v55  ;;  %v4216_v55 = vld [vmem:[#allocation56_spill] sm:$0xff] }
 0x305   :  { %4202 = vst [vmem:[#allocation10_spill] sm:$0xff] %v3629_v63  ;;  %1626 = vrot.lane.b32.xlu1 %v1560_v17, %s2480_s10  ;;  %v4208_v63 = vld [vmem:[#allocation30_spill] sm:$0xff]  ;;  %v793_v17 = vadd.f32 %v761_v21, %v573_v26  ;;  %v4215_v21 = vld [vmem:[#allocation55_spill] sm:$0xff] }
 0x306   :  { %1602 = vrot.lane.b32.xlu0 %v1548_v33, %s2480_s10  ;;  %v549_v1 = vsel %vm539_vm4, %v4209_v36, %v4208_v63  ;;  %v4213_v33 = vld [vmem:[#allocation54_spill] sm:$0xff]  ;;  %v988_v26 = vsel %vm978_vm11, %v4216_v55, %v4215_v21 }
 0x307   :  { %v769_v63 = vsel %vm759_vm10, %v4214_v57, %v4213_v33  ;;  %v581_v38 = vadd.f32 %v549_v1, %v361_v0  ;;  %v1012_v8 = vadd.f32 %v980_v25, %v793_v17  ;;  %v1345_v33 = vmul.f32 %v4210_v34, %v3132_v22  ;;  %v3684_v22 = vpop.permute.xlu0 %1812  ;;  %v4217_v17 = vld [vmem:[#allocation12_spill] sm:$0xff] }
 0x308   :  { %v3653_v2 = vpop.permute.xlu1 %1380  ;;  %v1344_v0 = vmul.f32 %v4210_v34, %v3117_v23  ;;  %v1208_v1 = vsel %vm1198_vm12, %v3409_v29, %v3414_v3  ;;  %v1640_v25 = vsel %vm1638_vm14, %v3536_v32, %v3563_v43  ;;  %v132_v23 = vmul.f32 %v4198_v11, %v4217_v17 }
 0x309   :  { %4212 = vst [vmem:[#allocation8_spill] sm:$0xff] %v3653_v2  ;;  %1392 = vrot.lane.b32.xlu1 %v1333_v31, %s2479_s7  ;;  %v801_v2 = vadd.f32 %v769_v63, %v581_v38  ;;  %v1232_v40 = vadd.f32 %v1200_v5, %v1012_v8  ;;  %v1428_v43 = vsel %vm1418_vm13, %v3483_v50, %v3465_v61  ;;  %v4219_v63 = vld [vmem:[#allocation50_spill] sm:$0xff] }
 0x30a   :  { %1390 = vrot.lane.b32.xlu0 %v1332_v20, %s2479_s7  ;;  %v4218_v20 = vld [vmem:[#allocation9_spill] sm:$0xff]  ;;  %v4220_v5 = vld [vmem:[#allocation14_spill] sm:$0xff] }
 0x30b   :  { %v1020_v49 = vadd.f32 %v988_v26, %v801_v2  ;;  %v1452_v31 = vadd.f32 %v1420_v58, %v1232_v40  ;;  %v320_v3 = vsel %vm319_vm3, %v4218_v20, %v4196_v62  ;;  %v1770_v2 = vmul.f32 %v4219_v63, %v3309_v14  ;;  %v4222_v40 = vld [vmem:[#allocation19_spill] sm:$0xff] }
 0x30c   :  { %v3673_v18 = vpop.permute.xlu1 %1404  ;;  %v328_v38 = vsel %vm319_vm3, %v4220_v5, %v4204_v4  ;;  %v1769_v58 = vmul.f32 %v4219_v63, %v3315_v37  ;;  %v540_v61 = vsel %vm539_vm4, %v4222_v40, %v4201_v27  ;;  %v4224_v27 = vld [vmem:[#allocation37_spill] sm:$0xff] }
 0x30d   :  { %1416 = vrot.lane.b32.xlu1 %v1345_v33, %s2479_s7  ;;  %v1240_v8 = vadd.f32 %v1208_v1, %v1020_v49  ;;  %v1672_v21 = vadd.f32 %v1640_v25, %v1452_v31  ;;  %v4221_v33 = vld [vmem:[#allocation16_spill] sm:$0xff]  ;;  %v352_v1 = vadd.f32 %v320_v3, %v132_v23  ;;  %v760_v20 = vsel %vm759_vm10, %v4224_v27, %v4206_v9 }
 0x30e   :  { %1414 = vrot.lane.b32.xlu0 %v1344_v0, %s2479_s7  ;;  %v140_v62 = vmul.f32 %v4198_v11, %v4221_v33  ;;  %v1648_v0 = vsel %vm1638_vm14, %v3545_v56, %v3573_v48  ;;  %v4223_v11 = vld [vmem:[#allocation27_spill] sm:$0xff]  ;;  %v1782_v48 = vmul.f32 %v4219_v63, %v3322_v16  ;;  %v1781_v3 = vmul.f32 %v4219_v63, %v3329_v42 }
 0x30f   :  { %v1460_v25 = vadd.f32 %v1428_v43, %v1240_v8  ;;  %v548_v17 = vsel %vm539_vm4, %v4223_v11, %v4209_v36  ;;  %v572_v5 = vadd.f32 %v540_v61, %v352_v1  ;;  %v979_v36 = vsel %vm978_vm11, %v3368_v41, %v3341_v30  ;;  %v4226_v30 = vld [vmem:[#allocation53_spill] sm:$0xff] }
 0x310   :  { %v1815_v26 = vpop.permute.xlu1 %1814  ;;  %v360_v31 = vadd.f32 %v328_v38, %v140_v62  ;;  %v4225_v38 = vld [vmem:[#allocation40_spill] sm:$0xff]  ;;  %v764_v8 = vsel %vm759_vm10, %v3555_v39, %v3495_v60  ;;  %v768_v41 = vsel %vm759_vm10, %v4226_v30, %v4214_v57  ;;  %v981_v61 = vsel %vm978_vm11, %v3475_v54, %v3442_v28 }
 0x311   :  { %v1860_v4 = vsel %vm1858_vm15, %v3684_v22, %v1815_v26  ;;  %1826 = vrot.lane.b32.xlu1 %v1770_v2, %s2481_s4  ;;  %v1680_v26 = vadd.f32 %v1648_v0, %v1460_v25  ;;  %v3722_v2 = vpop.permute.xlu0 %1836  ;;  %v762_v9 = vsel %vm759_vm10, %v4225_v38, %v3381_v45  ;;  %v792_v33 = vadd.f32 %v760_v20, %v572_v5  ;;  %v1910_v0 = vld [vmem:[%s4093_s2 + $0x18] sm:$0xff]  ;;  %v4227_v25 = vld [vmem:[#allocation22_spill] sm:$0xff]  ;;  %v4229_v5 = vld [vmem:[#allocation57_spill] sm:$0xff]  ;;  %s2482_s2 = smov 64  }
 0x312   :  { %1824 = vrot.lane.b32.xlu0 %v1769_v58, %s2481_s4  ;;  %v1892_v49 = vadd.f32 %v1860_v4, %v1672_v21  ;;  %v580_v58 = vadd.f32 %v548_v17, %v360_v31  ;;  %v1331_v39 = vmul.f32 %v4210_v34, %v3156_v7  ;;  %v1343_v4 = vmul.f32 %v4210_v34, %v3149_v19  ;;  %v4228_v31 = vld [vmem:[#allocation24_spill] sm:$0xff] }
 0x313   :  { %v1011_v1 = vadd.f32 %v979_v36, %v792_v33  ;;  %v796_v11 = vadd.f32 %v764_v8, %v4228_v31  ;;  %v1199_v7 = vsel %vm1198_vm12, %v3427_v44, %v3401_v51  ;;  %v770_v54 = vsel %vm759_vm10, %v3419_v15, %v3391_v12 }
 0x314   :  { %v1839_v23 = vpop.permute.xlu1 %1838  ;;  %v1932_v43 = vadd.f32 %v3493_v24, %v1892_v49  ;;  %v794_v49 = vadd.f32 %v762_v9, %v4227_v25  ;;  %v1201_v19 = vsel %vm1198_vm12, %v3565_v52, %v3515_v13  ;;  %v772_v51 = vsel %vm759_vm10, %v3583_v53, %v3505_v46  ;;  %v4231_v53 = vld [vmem:[#allocation64_spill] sm:$0xff] }
 0x315   :  { %v1868_v21 = vsel %vm1858_vm15, %v3722_v2, %v1839_v23  ;;  %1850 = vrot.lane.b32.xlu1 %v1782_v48, %s2481_s4  ;;  %v800_v48 = vadd.f32 %v768_v41, %v580_v58  ;;  %v987_v52 = vsel %vm978_vm11, %v4229_v5, %v4216_v55  ;;  %v1768_v23 = vmul.f32 %v4219_v63, %v3360_v6  ;;  %v4233_v58 = vld [vmem:[#allocation71_spill] sm:$0xff] }
 0x316   :  { %1848 = vrot.lane.b32.xlu0 %v1781_v3, %s2481_s4  ;;  %v1948_v62 = vmax.f32 %v1932_v43, 0.0  ;;  %v1900_v40 = vadd.f32 %v1868_v21, %v1680_v26  ;;  %v1013_v20 = vadd.f32 %v981_v61, %v794_v49  ;;  %v1419_v26 = vsel %vm1418_vm13, %v3485_v10, %v3470_v35  ;;  %v4230_v43 = vld [vmem:[#allocation31_spill] sm:$0xff]  ;;  %v4232_v21 = vld [vmem:[#allocation61_spill] sm:$0xff] }
 0x317   :  { %v1231_v3 = vadd.f32 %v1199_v7, %v1011_v1  ;;  %v802_v36 = vadd.f32 %v770_v54, %v4230_v43  ;;  %v989_v38 = vsel %vm978_vm11, %v4231_v53, %v3455_v59  ;;  %v1207_v55 = vsel %vm1198_vm12, %v4232_v21, %v3409_v29  ;;  %v4234_v10 = vld [vmem:[#allocation33_spill] sm:$0xff]  ;;  %v4236_v61 = vld [vmem:[#allocation67_spill] sm:$0xff]  ;;  %v4238_v29 = vld [vmem:[#allocation72_spill] sm:$0xff] }
 0x318   :  { %v943_v57 = vpop.permute.xlu1 %942  ;;  %2091 = vmatprep.mubr.f32.mxu0 %v1948_v62  ;;  %v1940_v17 = vadd.f32 %v3493_v24, %v1900_v40  ;;  %v1233_v9 = vadd.f32 %v1201_v19, %v1013_v20  ;;  %v1639_v35 = vsel %vm1638_vm14, %v4233_v58, %v3536_v32  ;;  %v804_v33 = vadd.f32 %v772_v51, %v4234_v10  ;;  %v4235_v62 = vld [vmem:[#allocation11_spill] sm:$0xff]  ;;  %v4241_v7 = vld [vmem:[#allocation65_spill] sm:$0xff]  ;;  %v4247_v10 = vld [vmem:[#allocation46_spill] sm:$0xff] }
 0x319   :  { %v983_v34 = vsel %vm978_vm11, %v943_v57, %v3588_v47  ;;  %1388 = vrot.lane.b32.xlu1 %v1331_v39, %s2479_s7  ;;  %v3768_v27 = vpop.permute.xlu0 %1918  ;;  %v1451_v41 = vadd.f32 %v1419_v26, %v1231_v3  ;;  %v4237_v39 = vld [vmem:[#allocation48_spill] sm:$0xff]  ;;  %v1019_v32 = vadd.f32 %v987_v52, %v800_v48  ;;  %v1021_v49 = vadd.f32 %v989_v38, %v802_v36  ;;  %v4240_v57 = vld [vmem:[#allocation49_spill] sm:$0xff]  ;;  %v4242_v20 = vld [vmem:[#allocation59_spill] sm:$0xff] }
 0x31a   :  { %v3773_v44 = vadd.f32 %v983_v34, %v796_v11  ;;  %1928 = vperm.xlu0 %2413, %v1910_v0   ;;  %v1956_v15 = vmax.f32 %v1940_v17, 0.0  ;;  %v1209_v0 = vsel %vm1198_vm12, %v4237_v39, %v4236_v61  ;;  %v4239_v11 = vld [vmem:[#allocation42_spill] sm:$0xff]  ;;  %v1427_v54 = vsel %vm1418_vm13, %v4241_v7, %v3483_v50  ;;  %v4243_v52 = vld [vmem:[#allocation73_spill] sm:$0xff]  ;;  %v4245_v36 = vld [vmem:[#allocation44_spill] sm:$0xff] }
 0x31b   :  { %v1552_v17 = vmul.f32 %v4240_v57, %v4239_v11  ;;  %v1671_v19 = vadd.f32 %v1639_v35, %v1451_v41  ;;  %v1780_v51 = vmul.f32 %v4219_v63, %v4242_v20  ;;  %v1241_v5 = vadd.f32 %v1209_v0, %v1021_v49  ;;  %v4244_v3 = vld [vmem:[#allocation13_spill] sm:$0xff]  ;;  %v4250_v49 = vld [vmem:[#allocation52_spill] sm:$0xff]  ;;  %v4251_v7 = vld [vmem:[#allocation66_spill] sm:$0xff] }
 0x31c   :  { %v1377_v8 = vpop.permute.xlu1 %1376  ;;  %2115 = vmatprep.mubr.f32.mxu1 %v1956_v15  ;;  %v1239_v15 = vadd.f32 %v1207_v55, %v1019_v32  ;;  %v1647_v26 = vsel %vm1638_vm14, %v4243_v52, %v3545_v56  ;;  %v1564_v53 = vmul.f32 %v4240_v57, %v4245_v36  ;;  %v4246_v38 = vld [vmem:[#allocation41_spill] sm:$0xff]  ;;  %v1772_v11 = vmul.f32 %v4250_v49, %v3315_v37  ;;  %v4255_v52 = vld [vmem:[#allocation36_spill] sm:$0xff] }
 0x31d   :  { %v1421_v40 = vsel %vm1418_vm13, %v1377_v8, %v4235_v62  ;;  %1822 = vrot.lane.b32.xlu1 %v1768_v23, %s2481_s4  ;;  %v967_v30 = vpop.permute.xlu0 %966  ;;  %v4254_v37 = vld [vmem:[#allocation25_spill] sm:$0xff] }
 0x31e   :  { %v3800_v1 = vadd.f32 %v1421_v40, %v1233_v9  ;;  %v991_v25 = vsel %vm978_vm11, %v967_v30, %v4238_v29  ;;  %1412 = vrot.lane.b32.xlu0 %v1343_v4, %s2479_s7  ;;  %v1459_v43 = vadd.f32 %v1427_v54, %v1239_v15  ;;  %v1553_v9 = vmul.f32 %v4240_v57, %v4246_v38  ;;  %v4248_v30 = vld [vmem:[#allocation43_spill] sm:$0xff]  ;;  %v4253_v15 = vld [vmem:[#allocation74_spill] sm:$0xff] }
 0x31f   :  { %v3805_v31 = vadd.f32 %v991_v25, %v804_v33  ;;  %v1551_v33 = vmul.f32 %v4240_v57, %v4247_v10  ;;  %v1565_v41 = vmul.f32 %v4240_v57, %v4248_v30  ;;  %v765_v54 = vsel %vm759_vm10, %v3495_v60, %v4251_v7 }
 0x320   :  { %v1811_v34 = vpop.permute.xlu1 %1810  ;;  %v1679_v21 = vadd.f32 %v1647_v26, %v1459_v43  ;;  %v1784_v26 = vmul.f32 %v4250_v49, %v3329_v42  ;;  %v1773_v43 = vmul.f32 %v4250_v49, %v3309_v14  ;;  %v4258_v42 = vld [vmem:[#allocation34_spill] sm:$0xff] }
 0x321   :  { %v1859_v4 = vsel %vm1858_vm15, %v1811_v34, %v3684_v22  ;;  %1610 = vrot.lane.b32.xlu1 %v1552_v17, %s2480_s10  ;;  %v1401_v48 = vpop.permute.xlu0 %1400  ;;  %v4252_v34 = vld [vmem:[#allocation45_spill] sm:$0xff] }
 0x322   :  { %v1891_v23 = vadd.f32 %v1859_v4, %v1671_v19  ;;  %v1429_v50 = vsel %vm1418_vm13, %v1401_v48, %v4244_v3  ;;  %1846 = vrot.lane.b32.xlu0 %v1780_v51, %s2481_s4  ;;  %v1563_v51 = vmul.f32 %v4240_v57, %v4252_v34  ;;  %v797_v48 = vadd.f32 %v765_v54, %v4254_v37  ;;  %v4256_v57 = vld [vmem:[#allocation68_spill] sm:$0xff] }
 0x323   :  { %v3823_v63 = vadd.f32 %v1429_v50, %v1241_v5  ;;  %v984_v5 = vsel %vm978_vm11, %v3588_v47, %v4253_v15 }
 0x324   :  { %v732_v22 = vpop.permute.xlu1 %731  ;;  %v1931_v8 = vadd.f32 %v3493_v24, %v1891_v23  ;;  %v773_v23 = vsel %vm759_vm10, %v3505_v46, %v4256_v57  ;;  %v1016_v47 = vadd.f32 %v984_v5, %v797_v48  ;;  %v1771_v46 = vmul.f32 %v4250_v49, %v3360_v6  ;;  %v4261_v48 = vld [vmem:[#allocation58_spill] sm:$0xff] }
 0x325   :  { %1634 = vrot.lane.b32.xlu1 %v1564_v53, %s2480_s10  ;;  %v1835_v56 = vpop.permute.xlu0 %1834  ;;  %v4257_v53 = vld [vmem:[#allocation10_spill] sm:$0xff]  ;;  %v1783_v6 = vmul.f32 %v4250_v49, %v4242_v20  ;;  %v4260_v20 = vld [vmem:[#allocation35_spill] sm:$0xff] }
 0x326   :  { %v1867_v55 = vsel %vm1858_vm15, %v1835_v56, %v3722_v2  ;;  %1612 = vrot.lane.b32.xlu0 %v1553_v9, %s2480_s10  ;;  %v1947_v58 = vmax.f32 %v1931_v8, 0.0  ;;  %v4249_v2 = vld [vmem:[#allocation28_spill] sm:$0xff]  ;;  %v992_v38 = vsel %vm978_vm11, %v4238_v29, %v4257_v53  ;;  %v805_v8 = vadd.f32 %v773_v23, %v4258_v42 }
 0x327   :  { %v1899_v35 = vadd.f32 %v1867_v55, %v1679_v21  ;;  %v1785_v56 = vmul.f32 %v4250_v49, %v3322_v16 }
 0x328   :  { %v756_v40 = vpop.permute.xlu1 %755  ;;  %2092 = vmatmul.mubr.f32.vlgmr.msra.gmra.mrb[0].mxu0 %v1947_v58  ;;  %v1024_v55 = vadd.f32 %v992_v38, %v805_v8  ;;  %v4265_v38 = vld [vmem:[#allocation69_spill] sm:$0xff] }
 0x329   :  { %1608 = vrot.lane.b32.xlu1 %v1551_v33, %s2480_s10  ;;  %v734_v39 = vpop.permute.xlu0 %733  ;;  %v1939_v0 = vadd.f32 %v3493_v24, %v1899_v35 }
 0x32a   :  { %v767_v25 = vsel %vm759_vm10, %v732_v22, %v734_v39  ;;  %1636 = vrot.lane.b32.xlu0 %v1565_v41, %s2480_s10  ;;  %v4259_v39 = vld [vmem:[#allocation26_spill] sm:$0xff] }
 0x32b   :  { %v799_v32 = vadd.f32 %v767_v25, %v4249_v2  ;;  %v1955_v17 = vmax.f32 %v1939_v0, 0.0 }
 0x32c   :  { %v1165_v19 = vpop.permute.xlu1 %1164 }
 0x32d   :  { %1830 = vrot.lane.b32.xlu1 %v1772_v11, %s2481_s4  ;;  %2116 = vmatmul.mubr.f32.vlgmr.msra.gmra.mrb[0].mxu1 %v1955_v17  ;;  %v758_v24 = vpop.permute.xlu0 %757 }
 0x32e   :  { %v775_v4 = vsel %vm759_vm10, %v756_v40, %v758_v24  ;;  %1632 = vrot.lane.b32.xlu0 %v1563_v51, %s2480_s10 }
 0x32f   :  { %v807_v60 = vadd.f32 %v775_v4, %v4255_v52  ;;  %v763_v52 = vsel %vm759_vm10, %v3381_v45, %v4261_v48  ;;  %v1202_v45 = vsel %vm1198_vm12, %v3515_v13, %v4265_v38 }
 0x330   :  { %v1189_v50 = vpop.permute.xlu1 %1188 }
 0x331   :  { %1854 = vrot.lane.b32.xlu1 %v1784_v26, %s2481_s4  ;;  %v1167_v36 = vpop.permute.xlu0 %1166 }
 0x332   :  { %v1204_v9 = vsel %vm1198_vm12, %v1165_v19, %v1167_v36  ;;  %1832 = vrot.lane.b32.xlu0 %v1773_v43, %s2481_s4  ;;  %v4263_v43 = vld [vmem:[#allocation23_spill] sm:$0xff]  ;;  %v4264_v36 = vld [vmem:[#allocation60_spill] sm:$0xff] }
 0x333   :  { %v3872_v21 = vadd.f32 %v1204_v9, %v1016_v47  ;;  %v771_v53 = vsel %vm759_vm10, %v3391_v12, %v4264_v36  ;;  %v4266_v9 = vld [vmem:[#allocation63_spill] sm:$0xff]  ;;  %v4269_v12 = vld [vmem:[#allocation70_spill] sm:$0xff] }
 0x334   :  { %v3876_v14 = vpop.permute.xlu1 %1598  ;;  %v990_v42 = vsel %vm978_vm11, %v3455_v59, %v4266_v9  ;;  %v1430_v59 = vsel %vm1418_vm13, %v4244_v3, %v3673_v18 }
 0x335   :  { %1828 = vrot.lane.b32.xlu1 %v1771_v46, %s2481_s4  ;;  %v1191_v29 = vpop.permute.xlu0 %1190 }
 0x336   :  { %v1212_v58 = vsel %vm1198_vm12, %v1189_v50, %v1191_v29  ;;  %1856 = vrot.lane.b32.xlu0 %v1785_v56, %s2481_s4  ;;  %v4268_v56 = vld [vmem:[#allocation32_spill] sm:$0xff] }
 0x337   :  { %v3883_v35 = vadd.f32 %v1212_v58, %v1024_v55  ;;  %v803_v55 = vadd.f32 %v771_v53, %v4268_v56 }
 0x338   :  { %v3885_v10 = vpop.permute.xlu1 %1622 }
 0x339   :  { %v1601_v33 = vpop.permute.xlu0 %1600 }
 0x33a   :  { %1852 = vrot.lane.b32.xlu0 %v1783_v6, %s2481_s4  ;;  %v1210_v6 = vsel %vm1198_vm12, %v4236_v61, %v4269_v12  ;;  %v1642_v13 = vsel %vm1638_vm14, %v3876_v14, %v1601_v33 }
 0x33c   :  { %v730_v30 = vpop.permute.xlu1 %729 }
 0x33d   :  { %v766_v16 = vsel %vm759_vm10, %v730_v30, %v732_v22  ;;  %v1625_v41 = vpop.permute.xlu0 %1624  ;;  %v1022_v30 = vadd.f32 %v990_v42, %v803_v55 }
 0x33e   :  { %v3892_v0 = vadd.f32 %v766_v16, %v4259_v39 }
 0x33f   :  { %v1242_v39 = vadd.f32 %v1210_v6, %v1022_v30 }
 0x340   :  { %v1163_v25 = vpop.permute.xlu1 %1162 }
 0x341   :  { %v1203_v2 = vsel %vm1198_vm12, %v1163_v25, %v1165_v19  ;;  %v754_v11 = vpop.permute.xlu0 %753 }
 0x342   :  { %v3896_v17 = vadd.f32 %v1203_v2, %v3773_v44  ;;  %v774_v7 = vsel %vm759_vm10, %v754_v11, %v756_v40  ;;  %v1650_v11 = vsel %vm1638_vm14, %v3885_v10, %v1625_v41 }
 0x343   :  { %v806_v49 = vadd.f32 %v774_v7, %v4260_v20  ;;  %v1462_v20 = vadd.f32 %v1430_v59, %v1242_v39 }
 0x344   :  { %v3900_v54 = vpop.permute.xlu1 %1596 }
 0x345   :  { %v1187_v34 = vpop.permute.xlu0 %1186  ;;  %v1682_v33 = vadd.f32 %v1650_v11, %v1462_v20 }
 0x346   :  { %v1211_v22 = vsel %vm1198_vm12, %v1187_v34, %v1189_v50 }
 0x347   :  { %v1243_v51 = vadd.f32 %v1211_v22, %v3805_v31  ;;  %v4262_v31 = vld [vmem:[#allocation62_spill] sm:$0xff] }
 0x348   :  { %v951_v24 = vpop.permute.xlu1 %950  ;;  %v982_v23 = vsel %vm978_vm11, %v3442_v28, %v4262_v31  ;;  %v4267_v28 = vld [vmem:[#allocation8_spill] sm:$0xff] }
 0x349   :  { %v1621_v15 = vpop.permute.xlu0 %1620  ;;  %v1422_v8 = vsel %vm1418_vm13, %v4235_v62, %v4267_v28 }
 0x34a   :  { %v1649_v36 = vsel %vm1638_vm14, %v1621_v15, %v3885_v10 }
 0x34c   :  { %v975_v5 = vpop.permute.xlu1 %974 }
 0x34d   :  { %v953_v4 = vpop.permute.xlu0 %952 }
 0x34e   :  { %v986_v19 = vsel %vm978_vm11, %v951_v24, %v953_v4 }
 0x34f   :  { %v3905_v37 = vadd.f32 %v986_v19, %v799_v32  ;;  %v795_v32 = vadd.f32 %v763_v52, %v4263_v43 }
 0x350   :  { %v3907_v44 = vpop.permute.xlu1 %1384 }
 0x351   :  { %v977_v40 = vpop.permute.xlu0 %976 }
 0x352   :  { %v994_v26 = vsel %vm978_vm11, %v975_v5, %v977_v40 }
 0x353   :  { %v3913_v57 = vadd.f32 %v994_v26, %v807_v60  ;;  %v1014_v60 = vadd.f32 %v982_v23, %v795_v32 }
 0x354   :  { %v3918_v50 = vpop.permute.xlu1 %1408 }
 0x355   :  { %v3921_v47 = vpop.permute.xlu0 %1386  ;;  %v1234_v29 = vadd.f32 %v1202_v45, %v1014_v60  ;;  %v1681_v45 = vadd.f32 %v1649_v36, %v3823_v63 }
 0x357   :  { %v1454_v16 = vadd.f32 %v1422_v8, %v1234_v29 }
 0x358   :  { %v1819_v46 = vpop.permute.xlu1 %1818 }
 0x359   :  { %v3936_v58 = vpop.permute.xlu0 %1410  ;;  %v1674_v25 = vadd.f32 %v1642_v13, %v1454_v16 }
 0x35a   :  { %v1432_v20 = vsel %vm1418_vm13, %v3918_v50, %v3936_v58 }
 0x35c   :  { %v1843_v62 = vpop.permute.xlu1 %1842 }
 0x35d   :  { %v1821_v2 = vpop.permute.xlu0 %1820 }
 0x35e   :  { %v1862_v7 = vsel %vm1858_vm15, %v1819_v46, %v1821_v2 }
 0x35f   :  { %v1894_v61 = vadd.f32 %v1862_v7, %v1674_v25 }
 0x360   :  { %v3949_v34 = vpop.permute.xlu1 %1923 }
 0x361   :  { %v1845_v22 = vpop.permute.xlu0 %1844  ;;  %v1934_v4 = vadd.f32 %v3768_v27, %v1894_v61 }
 0x362   :  { %v1870_v19 = vsel %vm1858_vm15, %v1843_v62, %v1845_v22 }
 0x363   :  { %v1902_v18 = vadd.f32 %v1870_v19, %v1682_v33  ;;  %v1950_v3 = vmax.f32 %v1934_v4, 0.0 }
 0x364   :  { %v973_v40 = vpop.permute.xlu1 %972 }
 0x365   :  { %v993_v48 = vsel %vm978_vm11, %v973_v40, %v975_v5  ;;  %2097 = vmatprep.mubr.f32.mxu0 %v1950_v3  ;;  %v949_v52 = vpop.permute.xlu0 %948  ;;  %v1942_v41 = vadd.f32 %v3768_v27, %v1902_v18 }
 0x366   :  { %v3955_v26 = vadd.f32 %v993_v48, %v806_v49  ;;  %v985_v31 = vsel %vm978_vm11, %v949_v52, %v951_v24  ;;  %v1641_v49 = vsel %vm1638_vm14, %v3900_v54, %v3876_v14 }
 0x367   :  { %v3959_v23 = vadd.f32 %v985_v31, %v3892_v0  ;;  %v1958_v43 = vmax.f32 %v1942_v41, 0.0  ;;  %v1673_v10 = vadd.f32 %v1641_v49, %v3800_v1 }
 0x368   :  { %v1407_v32 = vpop.permute.xlu1 %1406 }
 0x369   :  { %v1431_v53 = vsel %vm1418_vm13, %v1407_v32, %v3918_v50  ;;  %2121 = vmatprep.mubr.f32.mxu1 %v1958_v43  ;;  %v1383_v5 = vpop.permute.xlu0 %1382 }
 0x36a   :  { %v3968_v38 = vadd.f32 %v1431_v53, %v1243_v51  ;;  %v1423_v0 = vsel %vm1418_vm13, %v1383_v5, %v3907_v44 }
 0x36b   :  { %v1455_v24 = vadd.f32 %v1423_v0, %v3896_v17 }
 0x36c   :  { %v1841_v60 = vpop.permute.xlu1 %1840 }
 0x36d   :  { %v1869_v15 = vsel %vm1858_vm15, %v1841_v60, %v1843_v62  ;;  %v1817_v9 = vpop.permute.xlu0 %1816 }
 0x36e   :  { %v1901_v42 = vadd.f32 %v1869_v15, %v1681_v45  ;;  %v1861_v28 = vsel %vm1858_vm15, %v1817_v9, %v1819_v46 }
 0x36f   :  { %v1893_v8 = vadd.f32 %v1861_v28, %v1673_v10 }
 0x370   :  { %v3977_v14 = vpop.permute.xlu1 %1172  ;;  %v1941_v54 = vadd.f32 %v3768_v27, %v1901_v42 }
 0x371   :  { %v3980_v51 = vpop.permute.xlu0 %1170  ;;  %v1933_v17 = vadd.f32 %v3768_v27, %v1893_v8  ;;  %v1424_v27 = vsel %vm1418_vm13, %v3907_v44, %v3921_v47  ;;  %v1464_v44 = vadd.f32 %v1432_v20, %v3883_v35 }
 0x372   :  { %v1957_v56 = vmax.f32 %v1941_v54, 0.0  ;;  %v1456_v7 = vadd.f32 %v1424_v27, %v3872_v21 }
 0x373   :  { %v1949_v63 = vmax.f32 %v1933_v17, 0.0 }
 0x374   :  { %v3983_v55 = vpop.permute.xlu1 %1196  ;;  %2122 = vmatmul.mubr.f32.gmra.mrb[2].mxu1 %v1957_v56 }
 0x375   :  { %2098 = vmatmul.mubr.f32.gmra.mrb[2].mxu0 %v1949_v63  ;;  %v3985_v1 = vpop.permute.xlu0 %1194 }
 0x378   :  { %v1607_v29 = vpop.permute.xlu1 %1606 }
 0x379   :  { %v1605_v12 = vpop.permute.xlu0 %1604 }
 0x37a   :  { %v1644_v11 = vsel %vm1638_vm14, %v1605_v12, %v1607_v29  ;;  %v1206_v29 = vsel %vm1198_vm12, %v3980_v51, %v3977_v14 }
 0x37b   :  { %v1676_v33 = vadd.f32 %v1644_v11, %v1456_v7 }
 0x37c   :  { %v1631_v46 = vpop.permute.xlu1 %1630 }
 0x37d   :  { %v1629_v6 = vpop.permute.xlu0 %1628 }
 0x37e   :  { %v1652_v4 = vsel %vm1638_vm14, %v1629_v6, %v1631_v46  ;;  %v1238_v46 = vadd.f32 %v1206_v29, %v3905_v37 }
 0x37f   :  { %v1684_v3 = vadd.f32 %v1652_v4, %v1464_v44 }
 0x380   :  { %v3987_v13 = vpop.permute.xlu1 %1192 }
 0x381   :  { %v1169_v30 = vpop.permute.xlu0 %1168 }
 0x384   :  { %v1627_v16 = vpop.permute.xlu1 %1626 }
 0x385   :  { %v1603_v59 = vpop.permute.xlu0 %1602  ;;  %v1651_v49 = vsel %vm1638_vm14, %v1627_v16, %v1629_v6  ;;  %v1205_v6 = vsel %vm1198_vm12, %v1169_v30, %v3980_v51 }
 0x386   :  { %v1643_v58 = vsel %vm1638_vm14, %v1603_v59, %v1605_v12  ;;  %v1683_v10 = vadd.f32 %v1651_v49, %v3968_v38  ;;  %v1237_v14 = vadd.f32 %v1205_v6, %v3959_v23 }
 0x387   :  { %v1675_v35 = vadd.f32 %v1643_v58, %v1455_v24 }
 0x388   :  { %v1393_v62 = vpop.permute.xlu1 %1392 }
 0x389   :  { %v1391_v39 = vpop.permute.xlu0 %1390 }
 0x38a   :  { %v1426_v38 = vsel %vm1418_vm13, %v1391_v39, %v1393_v62 }
 0x38b   :  { %v1458_v27 = vadd.f32 %v1426_v38, %v1238_v46 }
 0x38c   :  { %v1417_v25 = vpop.permute.xlu1 %1416 }
 0x38d   :  { %v3992_v2 = vpop.permute.xlu0 %1414 }
 0x38e   :  { %v1434_v62 = vsel %vm1418_vm13, %v3992_v2, %v1417_v25 }
 0x390   :  { %v1827_v61 = vpop.permute.xlu1 %1826 }
 0x391   :  { %v1825_v22 = vpop.permute.xlu0 %1824 }
 0x392   :  { %v1864_v19 = vsel %vm1858_vm15, %v1825_v22, %v1827_v61 }
 0x393   :  { %v1896_v47 = vadd.f32 %v1864_v19, %v1676_v33 }
 0x394   :  { %v1851_v18 = vpop.permute.xlu1 %1850 }
 0x395   :  { %v1849_v40 = vpop.permute.xlu0 %1848  ;;  %v1936_v48 = vadd.f32 %v3949_v34, %v1896_v47 }
 0x396   :  { %v1872_v21 = vsel %vm1858_vm15, %v1849_v40, %v1851_v18 }
 0x397   :  { %v1904_v52 = vadd.f32 %v1872_v21, %v1684_v3  ;;  %v1952_v41 = vmax.f32 %v1936_v48, 0.0 }
 0x398   :  { %v1389_v50 = vpop.permute.xlu1 %1388 }
 0x399   :  { %2103 = vmatprep.mubr.f32.mxu0 %v1952_v41  ;;  %v4005_v31 = vpop.permute.xlu0 %1928  ;;  %v1944_v43 = vadd.f32 %v3949_v34, %v1904_v52  ;;  %v1425_v11 = vsel %vm1418_vm13, %v1389_v50, %v1391_v39 }
 0x39a   :  { %v1457_v61 = vadd.f32 %v1425_v11, %v1237_v14 }
 0x39b   :  { %v1960_v32 = vmax.f32 %v1944_v43, 0.0 }
 0x39c   :  { %v1823_v36 = vpop.permute.xlu1 %1822 }
 0x39d   :  { %v1863_v53 = vsel %vm1858_vm15, %v1823_v36, %v1825_v22  ;;  %2127 = vmatprep.mubr.f32.mxu1 %v1960_v32  ;;  %v1413_v5 = vpop.permute.xlu0 %1412 }
 0x39e   :  { %v1895_v0 = vadd.f32 %v1863_v53, %v1675_v35  ;;  %v1433_v25 = vsel %vm1418_vm13, %v1413_v5, %v3992_v2 }
 0x3a0   :  { %v1611_v45 = vpop.permute.xlu1 %1610  ;;  %v1935_v60 = vadd.f32 %v3949_v34, %v1895_v0 }
 0x3a1   :  { %v1847_v15 = vpop.permute.xlu0 %1846 }
 0x3a2   :  { %v1871_v9 = vsel %vm1858_vm15, %v1847_v15, %v1849_v40  ;;  %v1951_v42 = vmax.f32 %v1935_v60, 0.0 }
 0x3a3   :  { %v1903_v28 = vadd.f32 %v1871_v9, %v1683_v10 }
 0x3a4   :  { %v1635_v8 = vpop.permute.xlu1 %1634  ;;  %2104 = vmatmul.mubr.f32.gmra.mrb[4].mxu0 %v1951_v42 }
 0x3a5   :  { %v1613_v24 = vpop.permute.xlu0 %1612  ;;  %v1943_v54 = vadd.f32 %v3949_v34, %v1903_v28  ;;  %v1214_v34 = vsel %vm1198_vm12, %v3985_v1, %v3983_v55  ;;  %v1213_v55 = vsel %vm1198_vm12, %v3987_v13, %v3985_v1 }
 0x3a6   :  { %v1646_v59 = vsel %vm1638_vm14, %v1611_v45, %v1613_v24  ;;  %v1246_v37 = vadd.f32 %v1214_v34, %v3913_v57  ;;  %v1245_v19 = vadd.f32 %v1213_v55, %v3955_v26 }
 0x3a7   :  { %v1959_v17 = vmax.f32 %v1943_v54, 0.0  ;;  %v1678_v20 = vadd.f32 %v1646_v59, %v1458_v27 }
 0x3a8   :  { %v1609_v56 = vpop.permute.xlu1 %1608  ;;  %v1466_v23 = vadd.f32 %v1434_v62, %v1246_v37  ;;  %v1465_v48 = vadd.f32 %v1433_v25, %v1245_v19 }
 0x3a9   :  { %2128 = vmatmul.mubr.f32.gmra.mrb[4].mxu1 %v1959_v17  ;;  %v1637_v63 = vpop.permute.xlu0 %1636  ;;  %v1645_v51 = vsel %vm1638_vm14, %v1609_v56, %v1611_v45 }
 0x3aa   :  { %v1654_v33 = vsel %vm1638_vm14, %v1635_v8, %v1637_v63  ;;  %v1677_v4 = vadd.f32 %v1645_v51, %v1457_v61 }
 0x3ab   :  { %v1686_v44 = vadd.f32 %v1654_v33, %v1466_v23 }
 0x3ac   :  { %v1831_v12 = vpop.permute.xlu1 %1830 }
 0x3ad   :  { %v1633_v16 = vpop.permute.xlu0 %1632 }
 0x3ae   :  { %v1653_v13 = vsel %vm1638_vm14, %v1633_v16, %v1635_v8 }
 0x3af   :  { %v1685_v41 = vadd.f32 %v1653_v13, %v1465_v48 }
 0x3b0   :  { %v1855_v7 = vpop.permute.xlu1 %1854 }
 0x3b1   :  { %v1833_v30 = vpop.permute.xlu0 %1832 }
 0x3b2   :  { %v1866_v39 = vsel %vm1858_vm15, %v1831_v12, %v1833_v30 }
 0x3b3   :  { %v1898_v22 = vadd.f32 %v1866_v39, %v1678_v20 }
 0x3b4   :  { %v1829_v57 = vpop.permute.xlu1 %1828 }
 0x3b5   :  { %v1865_v47 = vsel %vm1858_vm15, %v1829_v57, %v1831_v12  ;;  %v1857_v18 = vpop.permute.xlu0 %1856  ;;  %v1938_v1 = vadd.f32 %v4005_v31, %v1898_v22 }
 0x3b6   :  { %v1897_v3 = vadd.f32 %v1865_v47, %v1677_v4  ;;  %v1874_v40 = vsel %vm1858_vm15, %v1855_v7, %v1857_v18 }
 0x3b7   :  { %v1906_v21 = vadd.f32 %v1874_v40, %v1686_v44  ;;  %v1954_v52 = vmax.f32 %v1938_v1, 0.0 }
 0x3b8   :  { %v1937_v2 = vadd.f32 %v4005_v31, %v1897_v3 }
 0x3b9   :  { %2109 = vmatprep.mubr.f32.mxu0 %v1954_v52  ;;  %v1853_v50 = vpop.permute.xlu0 %1852  ;;  %v1946_v26 = vadd.f32 %v4005_v31, %v1906_v21 }
 0x3ba   :  { %v1873_v58 = vsel %vm1858_vm15, %v1853_v50, %v1855_v7  ;;  %v1953_v43 = vmax.f32 %v1937_v2, 0.0 }
 0x3bb   :  { %v1905_v32 = vadd.f32 %v1873_v58, %v1685_v41  ;;  %v1962_v35 = vmax.f32 %v1946_v26, 0.0 }
 0x3bc   :  { %2110 = vmatmul.mubr.f32.gmra.mrb[6].mxu0 %v1953_v43 }
 0x3bd   :  { %2133 = vmatprep.mubr.f32.mxu1 %v1962_v35  ;;  %v1945_v36 = vadd.f32 %v4005_v31, %v1905_v32 }
 0x3bf   :  { %v1961_v53 = vmax.f32 %v1945_v36, 0.0 }
 0x3c1   :  { %2134 = vmatmul.mubr.f32.gmra.mrb[6].mxu1 %v1961_v53 }
 0x3fb   :  { %v2093_v5 = vpop.f32.mrb[0].mxu0 }
 0x3fc   :  { %2148 = vrot.lane.b32.xlu1 %v2093_v5, %s2482_s2  ;;  %v2095_v49 = vpop.f32.mrb[1].mxu0 }
 0x400   :  { %v2117_v0 = vpop.f32.mrb[0].mxu1 }
 0x401   :  { %v2119_v45 = vpop.f32.mrb[1].mxu1 }
 0x447   :  { %v4048_v60 = vpop.f32.mrb[2].mxu1 }
 0x448   :  { %v2099_v10 = vpop.f32.mrb[2].mxu0  ;;  %v4050_v15 = vpop.f32.mrb[3].mxu1 }
 0x449   :  { %2150 = vrot.lane.b32.xlu0 %v2099_v10, %s2482_s2  ;;  %v2101_v9 = vpop.f32.mrb[3].mxu0 }
 0x46e   :  { %v2149_v63 = vpop.permute.xlu1 %2148 }
 0x46f   :  { %v2172_v6 = vmax.f32 %v2093_v5, %v2149_v63 }
 0x477   :  { %v2105_v42 = vpop.f32.mrb[4].mxu0 }
 0x478   :  { %2152 = vrot.lane.b32.xlu1 %v2105_v42, %s2482_s2  ;;  %v2107_v31 = vpop.f32.mrb[5].mxu0 }
 0x47c   :  { %2156 = vrot.lane.b32.xlu1 %v2117_v0, %s2482_s2  ;;  %v2129_v28 = vpop.f32.mrb[4].mxu1 }
 0x47d   :  { %v2131_v8 = vpop.f32.mrb[5].mxu1 }
 0x480   :  { %2160 = vrot.lane.b32.xlu1 %v2129_v28, %s2482_s2 }
 0x484   :  { %2188 = vrot.lane.b32.xlu1 %v2095_v49, %s2482_s2 }
 0x488   :  { %2192 = vrot.lane.b32.xlu1 %v2107_v31, %s2482_s2 }
 0x48c   :  { %2196 = vrot.lane.b32.xlu1 %v2119_v45, %s2482_s2 }
 0x48f   :  { %v2111_v24 = vpop.f32.mrb[6].mxu0 }
 0x490   :  { %2200 = vrot.lane.b32.xlu1 %v2131_v8, %s2482_s2  ;;  %2154 = vrot.lane.b32.xlu0 %v2111_v24, %s2482_s2  ;;  %v2113_v54 = vpop.f32.mrb[7].mxu0 }
 0x494   :  { %2158 = vrot.lane.b32.xlu0 %v4048_v60, %s2482_s2  ;;  %v2135_v17 = vpop.f32.mrb[6].mxu1 }
 0x495   :  { %v2137_v56 = vpop.f32.mrb[7].mxu1 }
 0x498   :  { %2162 = vrot.lane.b32.xlu0 %v2135_v17, %s2482_s2 }
 0x49c   :  { %2190 = vrot.lane.b32.xlu0 %v2101_v9, %s2482_s2 }
 0x4a0   :  { %2194 = vrot.lane.b32.xlu0 %v2113_v54, %s2482_s2 }
 0x4a4   :  { %2198 = vrot.lane.b32.xlu0 %v4050_v15, %s2482_s2 }
 0x4a8   :  { %2202 = vrot.lane.b32.xlu0 %v2137_v56, %s2482_s2 }
 0x4bb   :  { %v2151_v62 = vpop.permute.xlu0 %2150 }
 0x4bc   :  { %v2173_v4 = vmax.f32 %v2099_v10, %v2151_v62 }
 0x4ea   :  { %v2153_v29 = vpop.permute.xlu1 %2152 }
 0x4eb   :  { %v2174_v27 = vmax.f32 %v2105_v42, %v2153_v29 }
 0x4ee   :  { %v2157_v38 = vpop.permute.xlu1 %2156 }
 0x4ef   :  { %v2176_v37 = vmax.f32 %v2117_v0, %v2157_v38 }
 0x4f2   :  { %v2161_v12 = vpop.permute.xlu1 %2160 }
 0x4f3   :  { %v2178_v61 = vmax.f32 %v2129_v28, %v2161_v12 }
 0x4f6   :  { %v2189_v46 = vpop.permute.xlu1 %2188 }
 0x4f7   :  { %v2212_v16 = vmax.f32 %v2095_v49, %v2189_v46 }
 0x4f9   :  { %v2220_v34 = vmax.f32 %v2172_v6, %v2212_v16 }
 0x4fa   :  { %v2193_v59 = vpop.permute.xlu1 %2192 }
 0x4fb   :  { %2229 = vst.msk [vmem:[#allocation5] sm:$0xff] %vm2228_vm0, %v2220_v34  ;;  %v2214_v11 = vmax.f32 %v2107_v31, %v2193_v59 }
 0x4fd   :  { %v2222_v14 = vmax.f32 %v2174_v27, %v2214_v11 }
 0x4fe   :  { %v2197_v7 = vpop.permute.xlu1 %2196 }
 0x4ff   :  { %2231 = vst.msk [vmem:[#allocation5 + $0x10] sm:$0xff] %vm2228_vm0, %v2222_v14  ;;  %v2216_v20 = vmax.f32 %v2119_v45, %v2197_v7 }
 0x501   :  { %v2224_v51 = vmax.f32 %v2176_v37, %v2216_v20 }
 0x502   :  { %v2201_v30 = vpop.permute.xlu1 %2200  ;;  %v2155_v55 = vpop.permute.xlu0 %2154 }
 0x503   :  { %2233 = vst.msk [vmem:[#allocation5 + $0x20] sm:$0xff] %vm2228_vm0, %v2224_v51  ;;  %v2218_v33 = vmax.f32 %v2131_v8, %v2201_v30  ;;  %v2175_v47 = vmax.f32 %v2111_v24, %v2155_v55 }
 0x505   :  { %v2226_v39 = vmax.f32 %v2178_v61, %v2218_v33 }
 0x506   :  { %v2159_v23 = vpop.permute.xlu0 %2158 }
 0x507   :  { %2235 = vst.msk [vmem:[#allocation5 + $0x30] sm:$0xff] %vm2228_vm0, %v2226_v39  ;;  %v2177_v3 = vmax.f32 %v4048_v60, %v2159_v23 }
 0x50a   :  { %v2163_v22 = vpop.permute.xlu0 %2162 }
 0x50b   :  { %v2179_v52 = vmax.f32 %v2135_v17, %v2163_v22 }
 0x50e   :  { %v2191_v25 = vpop.permute.xlu0 %2190 }
 0x50f   :  { %v2213_v57 = vmax.f32 %v2101_v9, %v2191_v25 }
 0x511   :  { %v2221_v19 = vmax.f32 %v2173_v4, %v2213_v57 }
 0x512   :  { %v2195_v44 = vpop.permute.xlu0 %2194 }
 0x513   :  { %2230 = vst.msk [vmem:[#allocation5 + $0x8] sm:$0xff] %vm2228_vm0, %v2221_v19  ;;  %v2215_v18 = vmax.f32 %v2113_v54, %v2195_v44 }
 0x515   :  { %v2223_v1 = vmax.f32 %v2175_v47, %v2215_v18 }
 0x516   :  { %v2199_v13 = vpop.permute.xlu0 %2198 }
 0x517   :  { %2232 = vst.msk [vmem:[#allocation5 + $0x18] sm:$0xff] %vm2228_vm0, %v2223_v1  ;;  %v2217_v40 = vmax.f32 %v4050_v15, %v2199_v13 }
 0x519   :  { %v2225_v48 = vmax.f32 %v2177_v3, %v2217_v40 }
 0x51a   :  { %v2203_v21 = vpop.permute.xlu0 %2202 }
 0x51b   :  { %2234 = vst.msk [vmem:[#allocation5 + $0x28] sm:$0xff] %vm2228_vm0, %v2225_v48  ;;  %v2219_v2 = vmax.f32 %v2137_v56, %v2203_v21 }
 0x51d   :  { %v2227_v41 = vmax.f32 %v2179_v52, %v2219_v2 }
 0x51f   :  { %2236 = vst.msk [vmem:[#allocation5 + $0x38] sm:$0xff] %vm2228_vm0, %v2227_v41 }
 0x520   :  { %2448 = shalt.err (!%p2445_p12)
}
 0x521   :  { %s2449_s19 = scalar_lea.hbm %s4096_s5, 1024 }
 0x522   :  { %p2450_p13 = scmp.ne.s32.totalorder %s4096_s5, %s2449_s19  ;;  %p2453_p0 = scmp.lt.u32.totalorder %s2449_s19, %s4096_s5 }
 0x524   :  { %p2455_p1 = pnand %p2453_p0, %p2450_p13 }
 0x526   :  { %2458 = shalt.err (!%p2455_p1)
}
 0x527   :  { %s2484_s24 = smov 128   ;;  %s2485_s25 = smov 8  }
 0x528   :  { %2248 = dma.vmem_to_hbm [thread:$0]  %s2243_s16, 1024, %s4096_s5, [#allocation4], %s2484_s24, %s2484_s24, %s2485_s25  }
 0x529   :  { %2461 = dma.done.wait [#allocation4], 1024  }
 0x52a   :  { %2462 = vsyncadd [#allocation4], 4294966272 }
 0x52b   :  { %2252 = vsyncpa [#allocation3], 1 }
 0x52c   :  { %2253 = vsyncpa [#allocation4], 1 }

</bundles_post_ra>
